<compile_context>
chip_gen: v7x
topology: tpu7x:2x2x1
jax: 0.10.0
libtpu: 0.0.40
codegen_flags: <defaults>
</compile_context>

<pallas_src>
import functools
import math

import jax
import jax.numpy as jnp
from jax.experimental import pallas as pl
from jax.experimental.pallas import tpu as pltpu


def _decoder_kernel(x_ref, ln1_ref, ln2_ref, wq_ref, wk_ref, wv_ref, wo_ref,
                    wg_ref, wu_ref, wd_ref, cos_ref, sin_ref,
                    out_ref, hn_ref, *, batch, seq, num_heads, head_dim, eps):
    i = pl.program_id(0)                 # MLP intermediate-dim chunk index
    B, S, H, hd = batch, seq, num_heads, head_dim
    D = H * hd
    half = hd // 2

    # ---- attention + both RMSNorms: once, on the first chunk step ----
    @pl.when(i == 0)
    def _attn_and_norms():
        x = x_ref[...]                                   # (B*S, D) f32 residual

        # input RMSNorm (f32 stats), bf16 activations for the MXU
        var = jnp.mean(x * x, axis=-1, keepdims=True)
        xn = (x * jax.lax.rsqrt(var + eps) * ln1_ref[0]).astype(jnp.bfloat16)

        # QKV projections for all batches at once ((B*S, D) rows)
        q = jnp.dot(xn, wq_ref[...], preferred_element_type=jnp.float32)
        k = jnp.dot(xn, wk_ref[...], preferred_element_type=jnp.float32)
        v = jnp.dot(xn, wv_ref[...], preferred_element_type=jnp.float32)

        # (B*S, D) -> (B*H, S, hd): batch and head merged into one einsum
        # batch dim (single rank-3 batched matmuls on the MXU).
        def to_heads(t):
            return jnp.swapaxes(t.reshape(B, S, H, hd), 1, 2).reshape(B * H, S, hd)

        q3 = to_heads(q)
        k3 = to_heads(k)
        v3 = to_heads(v).astype(jnp.bfloat16)

        # RoPE: t*cos + roll(t, hd/2)*sin', with the rotate-half sign already
        # folded into the sin table (wrapper).  roll uses the XLU slot.
        cos = cos_ref[...][None]                         # (1, S, hd)
        sin = sin_ref[...][None]                         # (1, S, hd), signed

        def rope(t):
            return t * cos + pltpu.roll(t, half, 2) * sin

        q3 = rope(q3).astype(jnp.bfloat16)
        k3 = rope(k3).astype(jnp.bfloat16)

        # attention scores for all (batch, head) pairs in one batched matmul
        scale = 1.0 / math.sqrt(hd)
        scores = jnp.einsum("gqd,gkd->gqk", q3, k3,
                            preferred_element_type=jnp.float32) * scale

        # in-kernel causal mask (no (S,S) HBM bias table)
        row = jax.lax.broadcasted_iota(jnp.int32, (S, S), 0)
        col = jax.lax.broadcasted_iota(jnp.int32, (S, S), 1)
        scores = jnp.where((col <= row)[None], scores, -1e30)

        # softmax: exp in f32; normalize AFTER the PV matmul (scale the small
        # (G,S,hd) ctx instead of the (G,S,S) probabilities)
        m = jnp.max(scores, axis=-1, keepdims=True)
        p = jnp.exp(scores - m)
        denom = jnp.sum(p, axis=-1, keepdims=True)       # (G, S, 1) f32

        ctx = jnp.einsum("gqk,gkd->gqd", p.astype(jnp.bfloat16), v3,
                         preferred_element_type=jnp.float32)
        ctx = ctx * pl.reciprocal(denom, approx=True)    # EUP reciprocal

        # merge heads back to (B*S, D) and apply the output projection
        attn = jnp.swapaxes(ctx.reshape(B, H, S, hd), 1, 2).reshape(B * S, D)
        attn = jnp.dot(attn.astype(jnp.bfloat16), wo_ref[...],
                       preferred_element_type=jnp.float32)

        h1 = x + attn                                    # residual 1 (f32)

        # post-attention RMSNorm, kept in a bf16 VMEM scratch that every MLP
        # chunk step reuses
        var2 = jnp.mean(h1 * h1, axis=-1, keepdims=True)
        hn_ref[...] = (h1 * jax.lax.rsqrt(var2 + eps)
                       * ln2_ref[0]).astype(jnp.bfloat16)

        # initialize the lane-dense output accumulator with residual-2 base
        out_ref[...] = h1.reshape(B, S * D)

    # ---- SwiGLU MLP, streamed over the intermediate dim (one chunk/step) ----
    hn = hn_ref[...]                                     # (B*S, D) bf16
    gate = jnp.dot(hn, wg_ref[...], preferred_element_type=jnp.float32)
    up = jnp.dot(hn, wu_ref[...], preferred_element_type=jnp.float32)
    act = (gate * jax.nn.sigmoid(gate) * up).astype(jnp.bfloat16)
    down = jnp.dot(act, wd_ref[...], preferred_element_type=jnp.float32)
    out_ref[...] += down.reshape(B, S * D)


def _vmem_budget_bytes():
    """3/4 of the device's VMEM if discoverable, else a conservative 64 MiB."""
    try:
        info = pltpu.get_tpu_info()
        cap = getattr(info, "vmem_capacity_bytes", None)
        if cap:
            return int(cap) * 3 // 4
    except Exception:
        pass
    return 64 * 1024 * 1024


def _pick_mlp_chunk(D, I, rows, vmem_budget):
    """Largest intermediate-dim chunk whose streamed footprint fits in VMEM."""
    # resident across all chunk steps: bf16 attn weights, f32 x block,
    # f32 output accumulator, bf16 normalized-hidden scratch, rope tables
    resident = 4 * D * D * 2 + rows * D * (4 + 4 + 2) + 4 * D * 4
    avail = max(vmem_budget - resident, 4 * 1024 * 1024)

    def fits(ti):
        # gate/up/down chunks, bf16, double-buffered by the pipeline
        return 3 * 2 * D * ti * 2 <= avail

    if fits(I):
        return I
    for cand in (2048, 1024, 512, 256, 128):
        if cand < I and I % cand == 0 and fits(cand):
            return cand
    return I


def llama_decoder_layer(x, params, *, num_heads, eps=1e-6, mlp_chunk=None):
    B, S, D = x.shape
    H = num_heads
    hd = D // H
    half = hd // 2
    I = params["w_gate"].shape[1]
    rows = B * S

    vmem_budget = _vmem_budget_bytes()
    ti = mlp_chunk if mlp_chunk is not None else _pick_mlp_chunk(D, I, rows, vmem_budget)
    assert I % ti == 0
    n_i = I // ti

    # RoPE tables (position_ids = arange(S)); rotate-half sign folded into sin
    inv_freq = 1.0 / (10000.0 ** (jnp.arange(0, hd, 2, dtype=jnp.float32) / hd))
    pos = jnp.arange(S, dtype=jnp.float32)
    freqs = pos[:, None] * inv_freq[None, :]                 # (S, hd/2)
    emb = jnp.concatenate([freqs, freqs], axis=-1)           # (S, hd)
    cos = jnp.cos(emb)
    sign = jnp.concatenate([-jnp.ones((half,), jnp.float32),
                            jnp.ones((half,), jnp.float32)])
    sin_signed = jnp.sin(emb) * sign[None, :]

    # bf16 weights (halves HBM traffic / VMEM, native MXU path)
    bf16 = jnp.bfloat16
    wq = params["wq"].astype(bf16)
    wk = params["wk"].astype(bf16)
    wv = params["wv"].astype(bf16)
    wo = params["wo"].astype(bf16)
    wg = params["w_gate"].astype(bf16)
    wu = params["w_up"].astype(bf16)
    wd = params["w_down"].astype(bf16)

    x2 = x.reshape(rows, D)                                  # (B*S, D)

    kernel = functools.partial(_decoder_kernel, batch=B, seq=S,
                               num_heads=H, head_dim=hd, eps=eps)

    const = lambda shape: pl.BlockSpec(shape, lambda i: (0,) * len(shape))

    flops = int(2 * rows * D * (4 * D + 3 * I) + 4 * rows * S * D)
    transcendentals = int(B * H * S * S + rows * I)
    bytes_accessed = int(2 * rows * D * 4                    # x + out (f32)
                         + (4 * D * D + 3 * D * I) * 2       # bf16 weights
                         + (2 * S * hd + 2 * D) * 4)         # tables + ln
    cost = pl.CostEstimate(flops=flops, transcendentals=transcendentals,
                           bytes_accessed=bytes_accessed)

    out = pl.pallas_call(
        kernel,
        out_shape=jax.ShapeDtypeStruct((B, S * D), jnp.float32),  # lane-dense
        grid_spec=pltpu.PrefetchScalarGridSpec(
            num_scalar_prefetch=0,
            grid=(n_i,),                       # only the MLP-chunk reduction axis
            in_specs=[
                const((rows, D)),                                  # x
                const((1, D)),                                     # ln1 weight
                const((1, D)),                                     # ln2 weight
                const((D, D)),                                     # wq
                const((D, D)),                                     # wk
                const((D, D)),                                     # wv
                const((D, D)),                                     # wo
                pl.BlockSpec((D, ti), lambda i: (0, i)),           # w_gate chunk
                pl.BlockSpec((D, ti), lambda i: (0, i)),           # w_up chunk
                pl.BlockSpec((ti, D), lambda i: (i, 0)),           # w_down chunk
                const((S, hd)),                                    # cos
                const((S, hd)),                                    # sin (signed)
            ],
            out_specs=pl.BlockSpec((B, S * D), lambda i: (0, 0)),
            scratch_shapes=[pltpu.VMEM((rows, D), jnp.bfloat16)],  # post-attn norm
        ),
        compiler_params=pltpu.CompilerParams(
            dimension_semantics=("arbitrary",),
            vmem_limit_bytes=vmem_budget),
        cost_estimate=cost,
    )(x2, params["ln1"], params["ln2"], wq, wk, wv, wo, wg, wu, wd,
      cos, sin_signed)

    return out.reshape(B, S, D)


# ---------------- pure-JAX f32 reference for correctness check ----------------
def reference(x, params, *, num_heads, eps=1e-6):
    B, S, D = x.shape
    hd = D // num_heads

    def rmsnorm(h, w):
        var = jnp.mean(h * h, axis=-1, keepdims=True)
        return h * jax.lax.rsqrt(var + eps) * w[0]

    inv_freq = 1.0 / (10000.0 ** (jnp.arange(0, hd, 2, dtype=jnp.float32) / hd))
    pos = jnp.arange(S, dtype=jnp.float32)
    emb = jnp.concatenate([pos[:, None] * inv_freq[None, :]] * 2, axis=-1)
    cos, sin = jnp.cos(emb), jnp.sin(emb)

    def rope(t):  # t: (B, H, S, hd)
        t1, t2 = t[..., :hd // 2], t[..., hd // 2:]
        rot = jnp.concatenate([-t2, t1], axis=-1)
        return t * cos + rot * sin

    xn = rmsnorm(x, params["ln1"])
    q = (xn @ params["wq"]).reshape(B, S, num_heads, hd).transpose(0, 2, 1, 3)
    k = (xn @ params["wk"]).reshape(B, S, num_heads, hd).transpose(0, 2, 1, 3)
    v = (xn @ params["wv"]).reshape(B, S, num_heads, hd).transpose(0, 2, 1, 3)
    q, k = rope(q), rope(k)
    scores = jnp.einsum("bhqd,bhkd->bhqk", q, k) / math.sqrt(hd)
    causal = jnp.tril(jnp.ones((S, S), bool))
    scores = jnp.where(causal, scores, -1e30)
    p = jax.nn.softmax(scores, axis=-1)
    attn = jnp.einsum("bhqk,bhkd->bhqd", p, v).transpose(0, 2, 1, 3).reshape(B, S, D)
    h1 = x + attn @ params["wo"]
    hn = rmsnorm(h1, params["ln2"])
    gate = hn @ params["w_gate"]
    mlp = (jax.nn.silu(gate) * (hn @ params["w_up"])) @ params["w_down"]
    return h1 + mlp


if __name__ == "__main__":
    # batch, seq, hidden, heads, intermediate; head_dim = 128 (Llama-like)
    B, S, D, H, I = 2, 8, 256, 2, 512
    key = jax.random.PRNGKey(0)
    ks = jax.random.split(key, 10)
    scale = 0.03

    params = {
        "ln1": 1.0 + 0.1 * jax.random.normal(ks[8], (1, D), jnp.float32),
        "ln2": 1.0 + 0.1 * jax.random.normal(ks[9], (1, D), jnp.float32),
        # stored as (in, out) so the kernel computes x @ W
        "wq": jax.random.normal(ks[1], (D, D), jnp.float32) * scale,
        "wk": jax.random.normal(ks[2], (D, D), jnp.float32) * scale,
        "wv": jax.random.normal(ks[3], (D, D), jnp.float32) * scale,
        "wo": jax.random.normal(ks[4], (D, D), jnp.float32) * scale,
        "w_gate": jax.random.normal(ks[5], (D, I), jnp.float32) * scale,
        "w_up": jax.random.normal(ks[6], (D, I), jnp.float32) * scale,
        "w_down": jax.random.normal(ks[7], (I, D), jnp.float32) * scale,
    }
    x = jax.random.normal(ks[0], (B, S, D), jnp.float32)

    # mlp_chunk=256 -> two grid steps, exercising the streamed accumulator path
    out = llama_decoder_layer(x, params, num_heads=H, mlp_chunk=256)
    out = jax.block_until_ready(out)

    ref = reference(x, params, num_heads=H)
    assert out.shape == (B, S, D)
    err = float(jnp.max(jnp.abs(out - ref)))
    # bf16 matmuls + bf16 hn scratch + approx softmax reciprocal vs pure f32
    assert err < 4e-2, err

    print("KERNEL_OK")
</pallas_src>

<mosaic_0001>
module attributes {stable_mosaic.version = 11 : i64} {
  func.func @_decoder_kernel(%arg0: i32, %arg1: memref<16x256xf32, #tpu.memory_space<vmem>>, %arg2: memref<1x256xf32, #tpu.memory_space<vmem>>, %arg3: memref<1x256xf32, #tpu.memory_space<vmem>>, %arg4: memref<256x256xbf16, #tpu.memory_space<vmem>>, %arg5: memref<256x256xbf16, #tpu.memory_space<vmem>>, %arg6: memref<256x256xbf16, #tpu.memory_space<vmem>>, %arg7: memref<256x256xbf16, #tpu.memory_space<vmem>>, %arg8: memref<256x256xbf16, #tpu.memory_space<vmem>>, %arg9: memref<256x256xbf16, #tpu.memory_space<vmem>>, %arg10: memref<256x256xbf16, #tpu.memory_space<vmem>>, %arg11: memref<8x128xf32, #tpu.memory_space<vmem>>, %arg12: memref<8x128xf32, #tpu.memory_space<vmem>>, %arg13: memref<2x2048xf32, #tpu.memory_space<vmem>>, %arg14: memref<16x256xbf16, #tpu.memory_space<vmem>>) attributes {dimension_semantics = [#tpu.dimension_semantics<arbitrary>], iteration_bounds = array<i64: 2>, scalar_prefetch = 0 : i64, scratch_operands = 1 : i64, tpu.core_type = #tpu.core_type<tc>, window_params = [{pipeline_mode = #tpu.pipeline_mode<synchronous>, transform_indices = @transform_0, window_bounds = array<i64: 16, 256>}, {pipeline_mode = #tpu.pipeline_mode<synchronous>, transform_indices = @transform_1, window_bounds = array<i64: 1, 256>}, {pipeline_mode = #tpu.pipeline_mode<synchronous>, transform_indices = @transform_2, window_bounds = array<i64: 1, 256>}, {pipeline_mode = #tpu.pipeline_mode<synchronous>, transform_indices = @transform_3, window_bounds = array<i64: 256, 256>}, {pipeline_mode = #tpu.pipeline_mode<synchronous>, transform_indices = @transform_4, window_bounds = array<i64: 256, 256>}, {pipeline_mode = #tpu.pipeline_mode<synchronous>, transform_indices = @transform_5, window_bounds = array<i64: 256, 256>}, {pipeline_mode = #tpu.pipeline_mode<synchronous>, transform_indices = @transform_6, window_bounds = array<i64: 256, 256>}, {transform_indices = @transform_7, window_bounds = array<i64: 256, 256>}, {transform_indices = @transform_8, window_bounds = array<i64: 256, 256>}, {transform_indices = @transform_9, window_bounds = array<i64: 256, 256>}, {pipeline_mode = #tpu.pipeline_mode<synchronous>, transform_indices = @transform_10, window_bounds = array<i64: 8, 128>}, {pipeline_mode = #tpu.pipeline_mode<synchronous>, transform_indices = @transform_11, window_bounds = array<i64: 8, 128>}, {pipeline_mode = #tpu.pipeline_mode<synchronous>, transform_indices = @transform_12, window_bounds = array<i64: 2, 2048>}]} {
    %c0_i32 = arith.constant 0 : i32
    %0 = arith.cmpi eq, %arg0, %c0_i32 : i32
    %1 = arith.extui %0 : i1 to i32
    %c0_i32_0 = arith.constant 0 : i32
    %2 = arith.cmpi ne, %1, %c0_i32_0 : i32
    scf.if %2 {
      %c0_15 = arith.constant 0 : index
      %c0_16 = arith.constant 0 : index
      %22 = vector.load %arg1[%c0_15, %c0_16] : memref<16x256xf32, #tpu.memory_space<vmem>>, vector<16x256xf32>
      %23 = arith.mulf %22, %22 : vector<16x256xf32>
      %cst_17 = arith.constant dense<0.000000e+00> : vector<16xf32>
      %24 = vector.multi_reduction <add>, %23, %cst_17 [1] : vector<16x256xf32> to vector<16xf32>
      %25 = vector.shape_cast %24 : vector<16xf32> to vector<16x1xf32>
      %cst_18 = arith.constant 2.560000e+02 : f32
      %26 = vector.broadcast %cst_18 : f32 to vector<16x1xf32>
      %27 = arith.divf %25, %26 : vector<16x1xf32>
      %cst_19 = arith.constant 9.99999997E-7 : f32
      %28 = vector.broadcast %cst_19 : f32 to vector<16x1xf32>
      %29 = arith.addf %27, %28 : vector<16x1xf32>
      %30 = math.rsqrt %29 : vector<16x1xf32>
      %31 = vector.broadcast %30 : vector<16x1xf32> to vector<16x256xf32>
      %32 = arith.mulf %22, %31 : vector<16x256xf32>
      %c0_20 = arith.constant 0 : index
      %c0_21 = arith.constant 0 : index
      %33 = vector.load %arg2[%c0_20, %c0_21] : memref<1x256xf32, #tpu.memory_space<vmem>>, vector<1x256xf32>
      %34 = vector.shape_cast %33 : vector<1x256xf32> to vector<256xf32>
      %35 = vector.shape_cast %34 : vector<256xf32> to vector<1x256xf32>
      %36 = vector.broadcast %35 : vector<1x256xf32> to vector<16x256xf32>
      %37 = arith.mulf %32, %36 : vector<16x256xf32>
      %38 = arith.truncf %37 : vector<16x256xf32> to vector<16x256xbf16>
      %c0_22 = arith.constant 0 : index
      %c0_23 = arith.constant 0 : index
      %39 = vector.load %arg4[%c0_22, %c0_23] : memref<256x256xbf16, #tpu.memory_space<vmem>>, vector<256x256xbf16>
      %cst_24 = arith.constant dense<0.000000e+00> : vector<16x256xf32>
      %40 = tpu.matmul %38, %39, %cst_24 {dimension_numbers = #tpu.dot_dimension_numbers<[1], [0], [0], [1], [0, 0, 1, 1], [], []>} : vector<16x256xbf16>, vector<256x256xbf16>, vector<16x256xf32> -> vector<16x256xf32>
      %c0_25 = arith.constant 0 : index
      %c0_26 = arith.constant 0 : index
      %41 = vector.load %arg5[%c0_25, %c0_26] : memref<256x256xbf16, #tpu.memory_space<vmem>>, vector<256x256xbf16>
      %cst_27 = arith.constant dense<0.000000e+00> : vector<16x256xf32>
      %42 = tpu.matmul %38, %41, %cst_27 {dimension_numbers = #tpu.dot_dimension_numbers<[1], [0], [0], [1], [0, 0, 1, 1], [], []>} : vector<16x256xbf16>, vector<256x256xbf16>, vector<16x256xf32> -> vector<16x256xf32>
      %c0_28 = arith.constant 0 : index
      %c0_29 = arith.constant 0 : index
      %43 = vector.load %arg6[%c0_28, %c0_29] : memref<256x256xbf16, #tpu.memory_space<vmem>>, vector<256x256xbf16>
      %cst_30 = arith.constant dense<0.000000e+00> : vector<16x256xf32>
      %44 = tpu.matmul %38, %43, %cst_30 {dimension_numbers = #tpu.dot_dimension_numbers<[1], [0], [0], [1], [0, 0, 1, 1], [], []>} : vector<16x256xbf16>, vector<256x256xbf16>, vector<16x256xf32> -> vector<16x256xf32>
      %45 = vector.shape_cast %40 : vector<16x256xf32> to vector<2x8x2x128xf32>
      %46 = tpu.transpose %45, [0, 2, 1, 3] : vector<2x8x2x128xf32> -> vector<2x2x8x128xf32>
      %47 = vector.shape_cast %46 : vector<2x2x8x128xf32> to vector<4x8x128xf32>
      %48 = vector.shape_cast %42 : vector<16x256xf32> to vector<2x8x2x128xf32>
      %49 = tpu.transpose %48, [0, 2, 1, 3] : vector<2x8x2x128xf32> -> vector<2x2x8x128xf32>
      %50 = vector.shape_cast %49 : vector<2x2x8x128xf32> to vector<4x8x128xf32>
      %51 = vector.shape_cast %44 : vector<16x256xf32> to vector<2x8x2x128xf32>
      %52 = tpu.transpose %51, [0, 2, 1, 3] : vector<2x8x2x128xf32> -> vector<2x2x8x128xf32>
      %53 = vector.shape_cast %52 : vector<2x2x8x128xf32> to vector<4x8x128xf32>
      %54 = arith.truncf %53 : vector<4x8x128xf32> to vector<4x8x128xbf16>
      %c0_31 = arith.constant 0 : index
      %c0_32 = arith.constant 0 : index
      %55 = vector.load %arg11[%c0_31, %c0_32] : memref<8x128xf32, #tpu.memory_space<vmem>>, vector<8x128xf32>
      %56 = vector.shape_cast %55 : vector<8x128xf32> to vector<1x8x128xf32>
      %c0_33 = arith.constant 0 : index
      %c0_34 = arith.constant 0 : index
      %57 = vector.load %arg12[%c0_33, %c0_34] : memref<8x128xf32, #tpu.memory_space<vmem>>, vector<8x128xf32>
      %58 = vector.shape_cast %57 : vector<8x128xf32> to vector<1x8x128xf32>
      %59 = vector.broadcast %56 : vector<1x8x128xf32> to vector<4x8x128xf32>
      %60 = arith.mulf %47, %59 : vector<4x8x128xf32>
      %c64_i32 = arith.constant 64 : i32
      %61 = tpu.dynamic_rotate %47 by %c64_i32 dim 2 : vector<4x8x128xf32>, i32 -> vector<4x8x128xf32>
      %62 = vector.broadcast %58 : vector<1x8x128xf32> to vector<4x8x128xf32>
      %63 = arith.mulf %61, %62 : vector<4x8x128xf32>
      %64 = arith.addf %60, %63 : vector<4x8x128xf32>
      %65 = arith.truncf %64 : vector<4x8x128xf32> to vector<4x8x128xbf16>
      %66 = vector.broadcast %56 : vector<1x8x128xf32> to vector<4x8x128xf32>
      %67 = arith.mulf %50, %66 : vector<4x8x128xf32>
      %c64_i32_35 = arith.constant 64 : i32
      %68 = tpu.dynamic_rotate %50 by %c64_i32_35 dim 2 : vector<4x8x128xf32>, i32 -> vector<4x8x128xf32>
      %69 = vector.broadcast %58 : vector<1x8x128xf32> to vector<4x8x128xf32>
      %70 = arith.mulf %68, %69 : vector<4x8x128xf32>
      %71 = arith.addf %67, %70 : vector<4x8x128xf32>
      %72 = arith.truncf %71 : vector<4x8x128xf32> to vector<4x8x128xbf16>
      "tpu.trace_start"() <{level = 10 : i32, message = "gqd,gkd->gqk"}> : () -> ()
      %cst_36 = arith.constant dense<0.000000e+00> : vector<4x8x8xf32>
      %73 = tpu.matmul %65, %72, %cst_36 {dimension_numbers = #tpu.dot_dimension_numbers<[2], [2], [1], [1], [0, 0, 0, 1, 1, 1], [0], [0]>} : vector<4x8x128xbf16>, vector<4x8x128xbf16>, vector<4x8x8xf32> -> vector<4x8x8xf32>
      "tpu.trace_stop"() : () -> ()
      %cst_37 = arith.constant 0.0883883461 : f32
      %74 = vector.broadcast %cst_37 : f32 to vector<4x8x8xf32>
      %75 = arith.mulf %73, %74 : vector<4x8x8xf32>
      %76 = tpu.iota {dimensions = array<i32: 0>} : vector<8x8xi32>
      %77 = tpu.iota {dimensions = array<i32: 1>} : vector<8x8xi32>
      %78 = arith.cmpi sle, %77, %76 : vector<8x8xi32>
      %79 = vector.shape_cast %78 : vector<8x8xi1> to vector<1x8x8xi1>
      %cst_38 = arith.constant -1.000000e+30 : f32
      %80 = vector.shape_cast %79 : vector<1x8x8xi1> to vector<1x8x8xi1>
      %81 = vector.broadcast %80 : vector<1x8x8xi1> to vector<4x8x8xi1>
      %82 = vector.broadcast %cst_38 : f32 to vector<4x8x8xf32>
      %83 = arith.select %81, %75, %82 : vector<4x8x8xi1>, vector<4x8x8xf32>
      %cst_39 = arith.constant dense<0xFF800000> : vector<4x8xf32>
      %84 = vector.multi_reduction <maximumf>, %83, %cst_39 [2] : vector<4x8x8xf32> to vector<4x8xf32>
      %85 = vector.shape_cast %84 : vector<4x8xf32> to vector<4x8x1xf32>
      %86 = vector.broadcast %85 : vector<4x8x1xf32> to vector<4x8x8xf32>
      %87 = arith.subf %83, %86 : vector<4x8x8xf32>
      %88 = math.exp %87 : vector<4x8x8xf32>
      %cst_40 = arith.constant dense<0.000000e+00> : vector<4x8xf32>
      %89 = vector.multi_reduction <add>, %88, %cst_40 [2] : vector<4x8x8xf32> to vector<4x8xf32>
      %90 = vector.shape_cast %89 : vector<4x8xf32> to vector<4x8x1xf32>
      %91 = arith.truncf %88 : vector<4x8x8xf32> to vector<4x8x8xbf16>
      "tpu.trace_start"() <{level = 10 : i32, message = "gqk,gkd->gqd"}> : () -> ()
      %cst_41 = arith.constant dense<0.000000e+00> : vector<4x8x128xf32>
      %92 = tpu.matmul %91, %54, %cst_41 {dimension_numbers = #tpu.dot_dimension_numbers<[2], [1], [1], [2], [0, 0, 0, 1, 1, 2], [0], [0]>} : vector<4x8x8xbf16>, vector<4x8x128xbf16>, vector<4x8x128xf32> -> vector<4x8x128xf32>
      "tpu.trace_stop"() : () -> ()
      %93 = tpu.reciprocal %90 {approx = true} : vector<4x8x1xf32> -> vector<4x8x1xf32>
      %94 = vector.broadcast %93 : vector<4x8x1xf32> to vector<4x8x128xf32>
      %95 = arith.mulf %92, %94 : vector<4x8x128xf32>
      %96 = vector.shape_cast %95 : vector<4x8x128xf32> to vector<2x2x8x128xf32>
      %97 = tpu.transpose %96, [0, 2, 1, 3] : vector<2x2x8x128xf32> -> vector<2x8x2x128xf32>
      %98 = vector.shape_cast %97 : vector<2x8x2x128xf32> to vector<16x256xf32>
      %99 = arith.truncf %98 : vector<16x256xf32> to vector<16x256xbf16>
      %c0_42 = arith.constant 0 : index
      %c0_43 = arith.constant 0 : index
      %100 = vector.load %arg7[%c0_42, %c0_43] : memref<256x256xbf16, #tpu.memory_space<vmem>>, vector<256x256xbf16>
      %cst_44 = arith.constant dense<0.000000e+00> : vector<16x256xf32>
      %101 = tpu.matmul %99, %100, %cst_44 {dimension_numbers = #tpu.dot_dimension_numbers<[1], [0], [0], [1], [0, 0, 1, 1], [], []>} : vector<16x256xbf16>, vector<256x256xbf16>, vector<16x256xf32> -> vector<16x256xf32>
      %102 = arith.addf %22, %101 : vector<16x256xf32>
      %103 = arith.mulf %102, %102 : vector<16x256xf32>
      %cst_45 = arith.constant dense<0.000000e+00> : vector<16xf32>
      %104 = vector.multi_reduction <add>, %103, %cst_45 [1] : vector<16x256xf32> to vector<16xf32>
      %105 = vector.shape_cast %104 : vector<16xf32> to vector<16x1xf32>
      %cst_46 = arith.constant 2.560000e+02 : f32
      %106 = vector.broadcast %cst_46 : f32 to vector<16x1xf32>
      %107 = arith.divf %105, %106 : vector<16x1xf32>
      %cst_47 = arith.constant 9.99999997E-7 : f32
      %108 = vector.broadcast %cst_47 : f32 to vector<16x1xf32>
      %109 = arith.addf %107, %108 : vector<16x1xf32>
      %110 = math.rsqrt %109 : vector<16x1xf32>
      %111 = vector.broadcast %110 : vector<16x1xf32> to vector<16x256xf32>
      %112 = arith.mulf %102, %111 : vector<16x256xf32>
      %c0_48 = arith.constant 0 : index
      %c0_49 = arith.constant 0 : index
      %113 = vector.load %arg3[%c0_48, %c0_49] : memref<1x256xf32, #tpu.memory_space<vmem>>, vector<1x256xf32>
      %114 = vector.shape_cast %113 : vector<1x256xf32> to vector<256xf32>
      %115 = vector.shape_cast %114 : vector<256xf32> to vector<1x256xf32>
      %116 = vector.broadcast %115 : vector<1x256xf32> to vector<16x256xf32>
      %117 = arith.mulf %112, %116 : vector<16x256xf32>
      %118 = arith.truncf %117 : vector<16x256xf32> to vector<16x256xbf16>
      %c0_50 = arith.constant 0 : index
      %c0_51 = arith.constant 0 : index
      %119 = vector.load %arg14[%c0_50, %c0_51] : memref<16x256xbf16, #tpu.memory_space<vmem>>, vector<16x256xbf16>
      tpu.vector_store %arg14[%c0_50, %c0_51], %118 {strides = array<i32>} : memref<16x256xbf16, #tpu.memory_space<vmem>>, vector<16x256xbf16>,
      %120 = vector.shape_cast %102 : vector<16x256xf32> to vector<2x2048xf32>
      %c0_52 = arith.constant 0 : index
      %c0_53 = arith.constant 0 : index
      %121 = vector.load %arg13[%c0_52, %c0_53] : memref<2x2048xf32, #tpu.memory_space<vmem>>, vector<2x2048xf32>
      tpu.vector_store %arg13[%c0_52, %c0_53], %120 {strides = array<i32>} : memref<2x2048xf32, #tpu.memory_space<vmem>>, vector<2x2048xf32>,
    } else {
    }
    %c0 = arith.constant 0 : index
    %c0_1 = arith.constant 0 : index
    %3 = vector.load %arg14[%c0, %c0_1] : memref<16x256xbf16, #tpu.memory_space<vmem>>, vector<16x256xbf16>
    %c0_2 = arith.constant 0 : index
    %c0_3 = arith.constant 0 : index
    %4 = vector.load %arg8[%c0_2, %c0_3] : memref<256x256xbf16, #tpu.memory_space<vmem>>, vector<256x256xbf16>
    %cst = arith.constant dense<0.000000e+00> : vector<16x256xf32>
    %5 = tpu.matmul %3, %4, %cst {dimension_numbers = #tpu.dot_dimension_numbers<[1], [0], [0], [1], [0, 0, 1, 1], [], []>} : vector<16x256xbf16>, vector<256x256xbf16>, vector<16x256xf32> -> vector<16x256xf32>
    %c0_4 = arith.constant 0 : index
    %c0_5 = arith.constant 0 : index
    %6 = vector.load %arg9[%c0_4, %c0_5] : memref<256x256xbf16, #tpu.memory_space<vmem>>, vector<256x256xbf16>
    %cst_6 = arith.constant dense<0.000000e+00> : vector<16x256xf32>
    %7 = tpu.matmul %3, %6, %cst_6 {dimension_numbers = #tpu.dot_dimension_numbers<[1], [0], [0], [1], [0, 0, 1, 1], [], []>} : vector<16x256xbf16>, vector<256x256xbf16>, vector<16x256xf32> -> vector<16x256xf32>
    %8 = arith.negf %5 : vector<16x256xf32>
    %9 = math.exp %8 : vector<16x256xf32>
    %cst_7 = arith.constant 1.000000e+00 : f32
    %10 = vector.broadcast %cst_7 : f32 to vector<16x256xf32>
    %11 = arith.addf %10, %9 : vector<16x256xf32>
    %12 = arith.divf %10, %11 : vector<16x256xf32>
    %13 = arith.mulf %5, %12 : vector<16x256xf32>
    %14 = arith.mulf %13, %7 : vector<16x256xf32>
    %15 = arith.truncf %14 : vector<16x256xf32> to vector<16x256xbf16>
    %c0_8 = arith.constant 0 : index
    %c0_9 = arith.constant 0 : index
    %16 = vector.load %arg10[%c0_8, %c0_9] : memref<256x256xbf16, #tpu.memory_space<vmem>>, vector<256x256xbf16>
    %cst_10 = arith.constant dense<0.000000e+00> : vector<16x256xf32>
    %17 = tpu.matmul %15, %16, %cst_10 {dimension_numbers = #tpu.dot_dimension_numbers<[1], [0], [0], [1], [0, 0, 1, 1], [], []>} : vector<16x256xbf16>, vector<256x256xbf16>, vector<16x256xf32> -> vector<16x256xf32>
    %c0_11 = arith.constant 0 : index
    %c0_12 = arith.constant 0 : index
    %18 = vector.load %arg13[%c0_11, %c0_12] : memref<2x2048xf32, #tpu.memory_space<vmem>>, vector<2x2048xf32>
    %19 = vector.shape_cast %17 : vector<16x256xf32> to vector<2x2048xf32>
    %20 = arith.addf %18, %19 : vector<2x2048xf32>
    %c0_13 = arith.constant 0 : index
    %c0_14 = arith.constant 0 : index
    %21 = vector.load %arg13[%c0_13, %c0_14] : memref<2x2048xf32, #tpu.memory_space<vmem>>, vector<2x2048xf32>
    tpu.vector_store %arg13[%c0_13, %c0_14], %20 {strides = array<i32>} : memref<2x2048xf32, #tpu.memory_space<vmem>>, vector<2x2048xf32>,
    return
  }
  func.func @transform_0(%arg0: i32) -> (i32, i32) {
    %c0_i32 = arith.constant 0 : i32
    %c0_i32_0 = arith.constant 0 : i32
    %c0_i32_1 = arith.constant 0 : i32
    return %c0_i32, %c0_i32_0 : i32, i32
  }
  func.func @transform_1(%arg0: i32) -> (i32, i32) {
    %c0_i32 = arith.constant 0 : i32
    %c0_i32_0 = arith.constant 0 : i32
    %c0_i32_1 = arith.constant 0 : i32
    return %c0_i32, %c0_i32_0 : i32, i32
  }
  func.func @transform_2(%arg0: i32) -> (i32, i32) {
    %c0_i32 = arith.constant 0 : i32
    %c0_i32_0 = arith.constant 0 : i32
    %c0_i32_1 = arith.constant 0 : i32
    return %c0_i32, %c0_i32_0 : i32, i32
  }
  func.func @transform_3(%arg0: i32) -> (i32, i32) {
    %c0_i32 = arith.constant 0 : i32
    %c0_i32_0 = arith.constant 0 : i32
    %c0_i32_1 = arith.constant 0 : i32
    return %c0_i32, %c0_i32_0 : i32, i32
  }
  func.func @transform_4(%arg0: i32) -> (i32, i32) {
    %c0_i32 = arith.constant 0 : i32
    %c0_i32_0 = arith.constant 0 : i32
    %c0_i32_1 = arith.constant 0 : i32
    return %c0_i32, %c0_i32_0 : i32, i32
  }
  func.func @transform_5(%arg0: i32) -> (i32, i32) {
    %c0_i32 = arith.constant 0 : i32
    %c0_i32_0 = arith.constant 0 : i32
    %c0_i32_1 = arith.constant 0 : i32
    return %c0_i32, %c0_i32_0 : i32, i32
  }
  func.func @transform_6(%arg0: i32) -> (i32, i32) {
    %c0_i32 = arith.constant 0 : i32
    %c0_i32_0 = arith.constant 0 : i32
    %c0_i32_1 = arith.constant 0 : i32
    return %c0_i32, %c0_i32_0 : i32, i32
  }
  func.func @transform_7(%arg0: i32) -> (i32, i32) {
    %c0_i32 = arith.constant 0 : i32
    %c0_i32_0 = arith.constant 0 : i32
    return %c0_i32, %arg0 : i32, i32
  }
  func.func @transform_8(%arg0: i32) -> (i32, i32) {
    %c0_i32 = arith.constant 0 : i32
    %c0_i32_0 = arith.constant 0 : i32
    return %c0_i32, %arg0 : i32, i32
  }
  func.func @transform_9(%arg0: i32) -> (i32, i32) {
    %c0_i32 = arith.constant 0 : i32
    %c0_i32_0 = arith.constant 0 : i32
    return %arg0, %c0_i32 : i32, i32
  }
  func.func @transform_10(%arg0: i32) -> (i32, i32) {
    %c0_i32 = arith.constant 0 : i32
    %c0_i32_0 = arith.constant 0 : i32
    %c0_i32_1 = arith.constant 0 : i32
    return %c0_i32, %c0_i32_0 : i32, i32
  }
  func.func @transform_11(%arg0: i32) -> (i32, i32) {
    %c0_i32 = arith.constant 0 : i32
    %c0_i32_0 = arith.constant 0 : i32
    %c0_i32_1 = arith.constant 0 : i32
    return %c0_i32, %c0_i32_0 : i32, i32
  }
  func.func @transform_12(%arg0: i32) -> (i32, i32) {
    %c0_i32 = arith.constant 0 : i32
    %c0_i32_0 = arith.constant 0 : i32
    %c0_i32_1 = arith.constant 0 : i32
    return %c0_i32, %c0_i32_0 : i32, i32
  }
}

</mosaic_0001>

<bundles_post_ra>
// kernel: tpu_custom_call.1
= control target key start
LH: loop header
LB: loop body
LE: loop exit
PB: predicated region body
PF: predicated region fallthrough
CT: control target
= control target key end

     0   :  { %s6406_s0 = inlined_call_operand.hbm [shape: f32[16,256], index: 0, kind: input, shape index: {}]   ;;  %s6407_s1 = inlined_call_operand.hbm [shape: f32[1,256], index: 1, kind: input, shape index: {}]   ;;  %s6408_s2 = inlined_call_operand.hbm [shape: f32[1,256], index: 2, kind: input, shape index: {}]   ;;  %s6409_s3 = inlined_call_operand.hbm [shape: bf16[256,256], index: 3, kind: input, shape index: {}]   ;;  %s6410_s4 = inlined_call_operand.hbm [shape: bf16[256,256], index: 4, kind: input, shape index: {}]   ;;  %s6411_s5 = inlined_call_operand.hbm [shape: bf16[256,256], index: 5, kind: input, shape index: {}]   ;;  %s6412_s6 = inlined_call_operand.hbm [shape: bf16[256,256], index: 6, kind: input, shape index: {}]   ;;  %s6413_s7 = inlined_call_operand.hbm [shape: bf16[256,512], index: 7, kind: input, shape index: {}]   ;;  %s6414_s8 = inlined_call_operand.hbm [shape: bf16[256,512], index: 8, kind: input, shape index: {}]   ;;  %s6415_s9 = inlined_call_operand.hbm [shape: bf16[512,256], index: 9, kind: input, shape index: {}]   ;;  %s6416_s10 = inlined_call_operand.hbm [shape: f32[8,128], index: 10, kind: input, shape index: {}]   ;;  %s6417_s11 = inlined_call_operand.hbm [shape: f32[8,128], index: 11, kind: input, shape index: {}]   ;;  %s6418_s12 = inlined_call_operand.hbm [shape: f32[2,2048], index: 12, kind: output, shape index: {}]  }
   0x1   :  { %6447 = sst [smem:[#allocation40_spill]] %s6407_s1 }
   0x2   :  { %6448 = sst [smem:[#allocation41_spill]] %s6409_s3 }
   0x3   :  { %6449 = sst [smem:[#allocation42_spill]] %s6411_s5 }
   0x4   :  { %6450 = sst [smem:[#allocation43_spill]] %s6413_s7 }
   0x5   :  { %6451 = sst [smem:[#allocation44_spill]] %s6415_s9 }
   0x6   :  { %6452 = sst [smem:[#allocation45_spill]] %s6416_s10 }
   0x7   :  { %6453 = sst [smem:[#allocation46_spill]] %s6418_s12 }
   0x8   :  { %17 = vsyncpa [#allocation4], 0 }
   0x9   :  { %18 = vsyncpa [#allocation7], 0 }
   0xa   :  { %19 = vsyncpa [#allocation10], 0 }
   0xb   :  { %20 = vsyncpa [#allocation13], 0 }
   0xc   :  { %21 = vsyncpa [#allocation16], 0 }
   0xd   :  { %23 = vsyncpa [#allocation16 + $0x1], 0 }
   0xe   :  { %24 = vsyncpa [#allocation19], 0 }
   0xf   :  { %26 = vsyncpa [#allocation19 + $0x1], 0 }
  0x10   :  { %27 = vsyncpa [#allocation22], 0 }
  0x11   :  { %28 = vsyncpa [#allocation5], 0  ;;  %s5577_s21 = smov 0   ;;  %s5579_s22 = smov 0  }
  0x12   :  { %s5581_s23 = smov 0   ;;  %s5583_s24 = smov 0  }
  0x13 LB: > { %6454 = sst [smem:[#allocation33_spill]] %s5478_s22  ;;  %s5488_s25 = smov [#allocation6]   ;;  %s5486_s24 = sphi %s5583_s24, %s6502_s24   ;;  %s5482_s23 = sphi %s5581_s23, %s6505_s23   ;;  %s5478_s22 = sphi %s5579_s22, %s6504_s22   ;;  %s5474_s21 = sphi %s5577_s21, %s6503_s21  }
  0x14   : > { %6455 = sst [smem:[#allocation34_spill]] %s5482_s23  ;;  %s353_s26 = sshll.u32 %s5488_s25, 4  ;;  %s354_s26 = int_to_ptr.vmem [resolvable:$true] %s353_s26 }
  0x15   : > { %s5598_s27 = sadd.s32 4294967295, %s5486_s24   ;;  %p4155_p0 = scmp.ge.s32.totalorder %s5486_s24, 1 }
  0x16   : > { %6456 = sst [smem:[#allocation35_spill]] %s5598_s27  ;;  %p6419_p1 = scmp.eq.s32.totalorder %s5598_s27, 0 }
  0x17   : > { %p327_p2 = scmp.lt.s32.totalorder %s5486_s24, 3  ;;  %s5489_s29 = smov [#allocation9]  }
  0x18   : > { %s374_s30 = sshll.u32 %s5489_s29, 4  ;;  %s5490_s14 = smov [#allocation12]   ;;  %s5610_s30 = int_to_ptr.vmem [resolvable:$true] %s374_s30 }
  0x19   : > { %p5604_p4 = pnand %p4155_p0, %p327_p2  ;;  %s400_s15 = sshll.u32 %s5490_s14, 4  ;;  %s5618_s15 = int_to_ptr.vmem [resolvable:$true] %s400_s15 }
  0x1a   : > { %s6460_s1 = sld [smem:[#allocation40_spill]] }
  0x1b   : > { %s6457_s28 = scalar_select %p5604_p4, 1, 0 }
  0x1c   : > { %p4560_p5 = pneg %p5604_p4 }
  0x1d   : > { %6458 = sst [smem:[#allocation36_spill]] %s6457_s28 }
  0x1e   : > { %p5614_p6 = pnand %p4560_p5, %p6419_p1 }
  0x20   : > { %s6459_s13 = scalar_select %p5614_p6, 1, 0 }
  0x21   : > { %s5052_s18 = scalar_lea.hbm %s6460_s1, 32  ;;  %p5628_p8 = pneg %p5614_p6 }
  0x22   : > { %p5053_p7 = scmp.ne.s32.totalorder %s6460_s1, %s5052_s18  ;;  %p5059_p11 = scmp.lt.u32.totalorder %s5052_s18, %s6460_s1 }
  0x23   : > { %s6461_s25 = scalar_select %p5628_p8, 1, 0 }
  0x24   : > { %p5055_p9 = pnand %p5628_p8, %p5053_p7 }
  0x26   : > { %p5056_p10 = pneg %p5055_p9 }
  0x28   : > { %p5061_p12 = pnand %p5059_p11, %p5056_p10 }
  0x2a   : > { %5064 = shalt.err (!%p5061_p12)
}
  0x2b   : > { %s5065_s16 = scalar_lea.vmem %s354_s26, 32  ;;  %p5073_p5 = scmp.lt.s32.totalorder %s354_s26, %s354_s26 }
  0x2c   : > { %p5066_p13 = scmp.ne.s32.totalorder %s354_s26, %s5065_s16  ;;  %p5074_p3 = scmp.lt.s32.totalorder %s5065_s16, %s5065_s16 }
  0x2e   : > { %p5068_p0 = pnand %p5066_p13, %p5628_p8  ;;  %p5075_p1 = por %p5074_p3, %p5073_p5 }
  0x30   : > { %p5069_p2 = pneg %p5068_p0 }
  0x32   : > { %p5076_p4 = pnand %p5075_p1, %p5069_p2 }
  0x34   : > { %5079 = shalt.err (!%p5076_p4)
}
  0x35   : > { %4566 = dma.hbm_to_vmem [thread:$0]  (!%p5614_p6), %s6460_s1, 32, %s354_s26, [#allocation7]  }
  0x36   : > { %s6462_s3 = sld [smem:[#allocation41_spill]] }
  0x3c   : > { %s5080_s29 = scalar_lea.hbm %s6462_s3, 4096 }
  0x3d   : > { %p5081_p7 = scmp.ne.s32.totalorder %s6462_s3, %s5080_s29  ;;  %p5087_p1 = scmp.lt.u32.totalorder %s5080_s29, %s6462_s3 }
  0x3f   : > { %p5083_p9 = pnand %p5081_p7, %p5628_p8 }
  0x41   : > { %p5084_p3 = pneg %p5083_p9 }
  0x43   : > { %p5089_p4 = pnand %p5087_p1, %p5084_p3 }
  0x45   : > { %5092 = shalt.err (!%p5089_p4)
}
  0x46   : > { %s5093_s26 = scalar_lea.vmem %s5610_s30, 4096  ;;  %p5101_p13 = scmp.lt.s32.totalorder %s5610_s30, %s5610_s30 }
  0x47   : > { %p5094_p10 = scmp.ne.s32.totalorder %s5610_s30, %s5093_s26  ;;  %p5102_p0 = scmp.lt.s32.totalorder %s5093_s26, %s5093_s26 }
  0x49   : > { %p5096_p11 = pnand %p5094_p10, %p5628_p8  ;;  %p5103_p2 = por %p5102_p0, %p5101_p13 }
  0x4b   : > { %p5097_p12 = pneg %p5096_p11 }
  0x4d   : > { %p5104_p5 = pnand %p5103_p2, %p5097_p12 }
  0x4f   : > { %5107 = shalt.err (!%p5104_p5)
}
  0x50   : > { %s6423_s12 = smov 128   ;;  %s6425_s28 = smov 8  }
  0x51   : > { %4572 = dma.hbm_to_vmem [thread:$0]  (!%p5614_p6), %s6462_s3, 4096, %s5610_s30, [#allocation10], %s6423_s12, %s6423_s12, %s6425_s28  }
  0x52   : > { %s6463_s5 = sld [smem:[#allocation42_spill]] }
  0x58   : > { %s5108_s29 = scalar_lea.hbm %s6463_s5, 4096 }
  0x59   : > { %p5109_p7 = scmp.ne.s32.totalorder %s6463_s5, %s5108_s29  ;;  %p5115_p1 = scmp.lt.u32.totalorder %s5108_s29, %s6463_s5 }
  0x5b   : > { %p5111_p9 = pnand %p5109_p7, %p5628_p8 }
  0x5d   : > { %p5112_p3 = pneg %p5111_p9 }
  0x5f   : > { %p5117_p4 = pnand %p5115_p1, %p5112_p3 }
  0x61   : > { %5120 = shalt.err (!%p5117_p4)
}
  0x62   : > { %s5121_s30 = scalar_lea.vmem %s5618_s15, 4096  ;;  %p5129_p13 = scmp.lt.s32.totalorder %s5618_s15, %s5618_s15 }
  0x63   : > { %p5122_p10 = scmp.ne.s32.totalorder %s5618_s15, %s5121_s30  ;;  %p5130_p0 = scmp.lt.s32.totalorder %s5121_s30, %s5121_s30 }
  0x65   : > { %p5124_p11 = pnand %p5122_p10, %p5628_p8  ;;  %p5131_p2 = por %p5130_p0, %p5129_p13 }
  0x67   : > { %p5125_p12 = pneg %p5124_p11 }
  0x69   : > { %p5132_p5 = pnand %p5131_p2, %p5125_p12 }
  0x6b   : > { %5135 = shalt.err (!%p5132_p5)
}
  0x6c   : > { %4578 = dma.hbm_to_vmem [thread:$0]  (!%p5614_p6), %s6463_s5, 4096, %s5618_s15, [#allocation13], %s6423_s12, %s6423_s12, %s6425_s28  }
  0x6d   : > { %s5493_s19 = smov [#allocation20]   ;;  %s6464_s10 = sld [smem:[#allocation45_spill]] }
  0x6e   : > { %s427_s18 = sshll.u32 %s5493_s19, 4  ;;  %s428_s18 = int_to_ptr.vmem [resolvable:$true] %s427_s18 }
  0x73   : > { %s5136_s14 = scalar_lea.hbm %s6464_s10, 128 }
  0x74   : > { %p5137_p7 = scmp.ne.s32.totalorder %s6464_s10, %s5136_s14  ;;  %p5143_p1 = scmp.lt.u32.totalorder %s5136_s14, %s6464_s10 }
  0x76   : > { %p5139_p9 = pnand %p5137_p7, %p5628_p8 }
  0x78   : > { %p5140_p3 = pneg %p5139_p9 }
  0x7a   : > { %p5145_p4 = pnand %p5143_p1, %p5140_p3 }
  0x7c   : > { %5148 = shalt.err (!%p5145_p4)
}
  0x7d   : > { %s5149_s15 = scalar_lea.vmem %s428_s18, 128  ;;  %p5157_p13 = scmp.lt.s32.totalorder %s428_s18, %s428_s18 }
  0x7e   : > { %p5150_p10 = scmp.ne.s32.totalorder %s428_s18, %s5149_s15  ;;  %p5158_p0 = scmp.lt.s32.totalorder %s5149_s15, %s5149_s15 }
  0x80   : > { %p5152_p11 = pnand %p5150_p10, %p5628_p8  ;;  %p5159_p2 = por %p5158_p0, %p5157_p13 }
  0x82   : > { %p5153_p12 = pneg %p5152_p11 }
  0x84   : > { %p5160_p5 = pnand %p5159_p2, %p5153_p12 }
  0x86   : > { %5163 = shalt.err (!%p5160_p5)
}
  0x87   : > { %4584 = dma.hbm_to_vmem [thread:$0]  (!%p5614_p6), %s6464_s10, 128, %s428_s18, [#allocation19]  }
  0x88   : > { %s5715_s3 = sadd.s32 1, %s5486_s24   ;;  %s188_s19 = sadd.s32 1, %s5482_s23 }
  0x89   : > { %6465 = sst [smem:[#allocation37_spill]] %s5715_s3  ;;  %s185_s20 = ssub.s32 %s5486_s24, %s5715_s3 }
  0x8a   : > { %p195_p7 = scmp.ne.s32.totalorder %s5482_s23, %s5478_s22  ;;  %p186_p9 = scmp.eq.s32.totalorder %s185_s20, 0 }
  0x8b   : > { %p196_p3 = scmp.eq.s32.totalorder %s5486_s24, 0  ;;  %p201_p1 = scmp.ne.s32.totalorder %s5478_s22, %s5474_s21 }
  0x8c   : > { %s5726_s29 = scalar_select %p186_p9, %s5482_s23, %s188_s19  }
  0x8d   : > { %p197_p4 = por %p196_p3, %p195_p7  ;;  %p6467_p10 = scmp.eq.s32.totalorder %s5598_s27, 0 }
  0x8e   : > { %6466 = sst [smem:[#allocation38_spill]] %s5726_s29  ;;  %p4607_p12 = scmp.lt.s32.totalorder %s5486_s24, 2 }
  0x8f   : > { %p5730_p11 = por %p6467_p10, %p201_p1  ;;  %s6427_s18 = sand.u32 1, %s5486_s24  }
  0x90   : > { %s451_s16 = sand.u32 1, %s5482_s23   ;;  %s4446_s30 = sshll.u32 %s5486_s24, 7 }
  0x91   : > { %s6468_s14 = scalar_select %p5730_p11, 1, 0 }
  0x92   : > { %s5737_s26 = sshll.u32 %s451_s16, 8  ;;  %s6470_s7 = sld [smem:[#allocation43_spill]] }
  0x93   : > { %6469 = sst [smem:[#allocation39_spill]] %s6468_s14  ;;  %s453_s21 = scalar_lea.vmem [#allocation15], %s5737_s26 }
  0x94   : > { %s460_s19 = sshll.u32 %s453_s21, 4  ;;  %p5746_p13 = pnand %p4607_p12, %p197_p4  ;;  %s5750_s19 = int_to_ptr.vmem [resolvable:$true] %s460_s19 }
  0x95   : > { %s5755_s28 = scalar_lea.hbm %s6414_s8, %s4446_s30  ;;  %s5759_s15 = scalar_lea.sflag [#allocation16], %s6427_s18 }
  0x96   : > { %s6471_s20 = scalar_select %p5746_p13, 1, 0 }
  0x97   : > { %p5765_p2 = pneg %p5746_p13 }
  0x98   : > { %s5743_s17 = scalar_lea.hbm %s6470_s7, %s4446_s30  ;;  %s5169_s12 = scalar_lea.hbm %s6470_s7, 8192 }
  0x99   : > { %s5164_s1 = scalar_lea.hbm %s5743_s17, 4096  ;;  %p5170_p9 = scmp.lt.u32.totalorder %s5743_s17, %s6470_s7 }
  0x9a   : > { %p5165_p0 = scmp.ne.s32.totalorder %s5743_s17, %s5164_s1  ;;  %p5171_p3 = scmp.lt.u32.totalorder %s5169_s12, %s5164_s1 }
  0x9b   : > { %s6472_s21 = scalar_select %p5765_p2, 1, 0 }
  0x9c   : > { %p5167_p5 = pnand %p5765_p2, %p5165_p0  ;;  %p5172_p1 = por %p5171_p3, %p5170_p9 }
  0x9d   : > { %p5173_p4 = scmp.lt.u32.totalorder %s5164_s1, %s5743_s17 }
  0x9e   : > { %p5168_p7 = pneg %p5167_p5 }
  0x9f   : > { %p5174_p10 = por %p5173_p4, %p5172_p1 }
  0xa1   : > { %p5175_p12 = pnand %p5174_p10, %p5168_p7 }
  0xa3   : > { %5178 = shalt.err (!%p5175_p12)
}
  0xa4   : > { %s5179_s18 = scalar_lea.vmem %s5750_s19, 4096  ;;  %s5494_s5 = smov [#allocation15]  }
  0xa5   : > { %p5180_p0 = scmp.ne.s32.totalorder %s5750_s19, %s5179_s18  ;;  %s5184_s10 = sshll.u32 %s5494_s5, 4  ;;  %s5185_s10 = int_to_ptr.vmem [resolvable:$false] %s5184_s10 }
  0xa6   : > { %s5186_s30 = scalar_lea.vmem %s5185_s10, 8192  ;;  %p5187_p6 = scmp.lt.s32.totalorder %s5750_s19, %s5185_s10 }
  0xa7   : > { %p5182_p5 = pnand %p5180_p0, %p5765_p2  ;;  %p5188_p8 = scmp.lt.s32.totalorder %s5186_s30, %s5179_s18 }
  0xa9   : > { %p5183_p11 = pneg %p5182_p5  ;;  %p5189_p9 = por %p5188_p8, %p5187_p6 }
  0xab   : > { %p5190_p3 = pnand %p5189_p9, %p5183_p11 }
  0xad   : > { %5193 = shalt.err (!%p5190_p3)
}
  0xae   : > { %s5495_s1 = smov 256   ;;  %s6473_s12 = smov 8  }
  0xaf   : > { %s6474_s16 = smov 128   ;;  %s5496_s7 = smov [#allocation3]  }
  0xb0   : > { %4591 = dma.hbm_to_vmem [thread:$0]  (!%p5746_p13), %s5743_s17, 4096, %s5750_s19, %s5759_s15, %s5495_s1, %s6474_s16, %s6473_s12  }
  0xb1   : > { %s339_s5 = sshll.u32 %s5496_s7, 4  ;;  %s5194_s18 = scalar_lea.hbm %s6406_s0, 512  ;;  %s340_s5 = int_to_ptr.vmem [resolvable:$true] %s339_s5 }
  0xb2   : > { %p5195_p6 = scmp.ne.s32.totalorder %s6406_s0, %s5194_s18  ;;  %p6475_p8 = scmp.ne.s32.totalorder %s6461_s25, 0 }
  0xb3   : > { %p5201_p1 = scmp.lt.u32.totalorder %s5194_s18, %s6406_s0 }
  0xb4   : > { %p5197_p11 = pnand %p5195_p6, %p6475_p8 }
  0xb6   : > { %p5198_p7 = pneg %p5197_p11 }
  0xb8   : > { %p5203_p4 = pnand %p5201_p1, %p5198_p7 }
  0xba   : > { %5206 = shalt.err (!%p5203_p4)
}
  0xbb   : > { %s5207_s17 = scalar_lea.vmem %s340_s5, 512  ;;  %p5215_p5 = scmp.lt.s32.totalorder %s340_s5, %s340_s5 }
  0xbc   : > { %p5208_p10 = scmp.ne.s32.totalorder %s340_s5, %s5207_s17  ;;  %p5216_p9 = scmp.lt.s32.totalorder %s5207_s17, %s5207_s17 }
  0xbe   : > { %p5210_p12 = pnand %p5208_p10, %p6475_p8  ;;  %p5217_p3 = por %p5216_p9, %p5215_p5 }
  0xc0   : > { %p5211_p0 = pneg %p5210_p12 }
  0xc2   : > { %p5218_p13 = pnand %p5217_p3, %p5211_p0 }
  0xc4   : > { %5221 = shalt.err (!%p5218_p13)
}
  0xc5   : > { %s5497_s7 = smov 16   ;;  %p6476_p6 = scmp.ne.s32.totalorder %s6459_s13, 0 }
  0xc6   : > { %s5498_s29 = smov [#allocation8]   ;;  %s5499_s19 = smov [#allocation11]  }
  0xc7   : > { %4563 = dma.hbm_to_vmem [thread:$0]  (!%p6476_p6), %s6406_s0, 512, %s340_s5, [#allocation4], %s5495_s1, %s5495_s1, %s5497_s7  }
  0xc8   : > { %s364_s14 = sshll.u32 %s5498_s29, 4  ;;  %s387_s10 = sshll.u32 %s5499_s19, 4  ;;  %s365_s14 = int_to_ptr.vmem [resolvable:$true] %s364_s14  ;;  %s388_s10 = int_to_ptr.vmem [resolvable:$true] %s387_s10 }
  0xc9   : > { %s5222_s17 = scalar_lea.hbm %s6408_s2, 32 }
  0xca   : > { %p5223_p13 = scmp.ne.s32.totalorder %s6408_s2, %s5222_s17  ;;  %p5229_p1 = scmp.lt.u32.totalorder %s5222_s17, %s6408_s2 }
  0xcc   : > { %p5225_p11 = pnand %p5223_p13, %p6475_p8 }
  0xce   : > { %p5226_p7 = pneg %p5225_p11 }
  0xd0   : > { %p5231_p4 = pnand %p5229_p1, %p5226_p7 }
  0xd2   : > { %5234 = shalt.err (!%p5231_p4)
}
  0xd3   : > { %s5235_s5 = scalar_lea.vmem %s365_s14, 32  ;;  %p5243_p5 = scmp.lt.s32.totalorder %s365_s14, %s365_s14 }
  0xd4   : > { %p5236_p10 = scmp.ne.s32.totalorder %s365_s14, %s5235_s5  ;;  %p5244_p9 = scmp.lt.s32.totalorder %s5235_s5, %s5235_s5 }
  0xd6   : > { %p5238_p12 = pnand %p5236_p10, %p6475_p8  ;;  %p5245_p3 = por %p5244_p9, %p5243_p5 }
  0xd8   : > { %p5239_p0 = pneg %p5238_p12 }
  0xda   : > { %p5246_p2 = pnand %p5245_p3, %p5239_p0 }
  0xdc   : > { %5249 = shalt.err (!%p5246_p2)
}
  0xdd   : > { %4569 = dma.hbm_to_vmem [thread:$0]  (!%p6476_p6), %s6408_s2, 32, %s365_s14, [#allocation7]  }
  0xde   : > { %s5250_s3 = scalar_lea.hbm %s6410_s4, 4096 }
  0xdf   : > { %p5251_p13 = scmp.ne.s32.totalorder %s6410_s4, %s5250_s3  ;;  %p5257_p2 = scmp.lt.u32.totalorder %s5250_s3, %s6410_s4 }
  0xe1   : > { %p5253_p11 = pnand %p5251_p13, %p6475_p8 }
  0xe3   : > { %p5254_p7 = pneg %p5253_p11 }
  0xe5   : > { %p5259_p1 = pnand %p5257_p2, %p5254_p7 }
  0xe7   : > { %5262 = shalt.err (!%p5259_p1)
}
  0xe8   : > { %s5263_s17 = scalar_lea.vmem %s388_s10, 4096  ;;  %p5271_p0 = scmp.lt.s32.totalorder %s388_s10, %s388_s10 }
  0xe9   : > { %p5264_p4 = scmp.ne.s32.totalorder %s388_s10, %s5263_s17  ;;  %p5272_p5 = scmp.lt.s32.totalorder %s5263_s17, %s5263_s17 }
  0xeb   : > { %p5266_p10 = pnand %p5264_p4, %p6475_p8  ;;  %p5273_p9 = por %p5272_p5, %p5271_p0 }
  0xed   : > { %p5267_p12 = pneg %p5266_p10 }
  0xef   : > { %p5274_p3 = pnand %p5273_p9, %p5267_p12 }
  0xf1   : > { %5277 = shalt.err (!%p5274_p3)
}
  0xf2   : > { %4575 = dma.hbm_to_vmem [thread:$0]  (!%p6476_p6), %s6410_s4, 4096, %s388_s10, [#allocation10], %s6474_s16, %s6474_s16, %s6473_s12  }
  0xf3   : > { %s5500_s5 = smov [#allocation14]   ;;  %s5501_s27 = smov [#allocation21]  }
  0xf4   : > { %s413_s22 = sshll.u32 %s5500_s5, 4  ;;  %s438_s9 = sshll.u32 %s5501_s27, 4  ;;  %s414_s22 = int_to_ptr.vmem [resolvable:$true] %s413_s22  ;;  %s439_s9 = int_to_ptr.vmem [resolvable:$true] %s438_s9 }
  0xf5   : > { %s5278_s29 = scalar_lea.hbm %s6412_s6, 4096 }
  0xf6   : > { %p5279_p13 = scmp.ne.s32.totalorder %s6412_s6, %s5278_s29  ;;  %p5285_p2 = scmp.lt.u32.totalorder %s5278_s29, %s6412_s6 }
  0xf8   : > { %p5281_p11 = pnand %p5279_p13, %p6475_p8 }
  0xfa   : > { %p5282_p7 = pneg %p5281_p11 }
  0xfc   : > { %p5287_p1 = pnand %p5285_p2, %p5282_p7 }
  0xfe   : > { %5290 = shalt.err (!%p5287_p1)
}
  0xff   : > { %s5291_s10 = scalar_lea.vmem %s414_s22, 4096  ;;  %p5299_p0 = scmp.lt.s32.totalorder %s414_s22, %s414_s22 }
 0x100   : > { %p5292_p4 = scmp.ne.s32.totalorder %s414_s22, %s5291_s10  ;;  %p5300_p5 = scmp.lt.s32.totalorder %s5291_s10, %s5291_s10 }
 0x102   : > { %p5294_p10 = pnand %p5292_p4, %p6475_p8  ;;  %p5301_p9 = por %p5300_p5, %p5299_p0 }
 0x104   : > { %p5295_p12 = pneg %p5294_p10 }
 0x106   : > { %p5302_p3 = pnand %p5301_p9, %p5295_p12 }
 0x108   : > { %5305 = shalt.err (!%p5302_p3)
}
 0x109   : > { %4581 = dma.hbm_to_vmem [thread:$0]  (!%p6476_p6), %s6412_s6, 4096, %s414_s22, [#allocation13], %s6474_s16, %s6474_s16, %s6473_s12  }
 0x10a   : > { %s5306_s7 = scalar_lea.hbm %s6417_s11, 128 }
 0x10b   : > { %p5307_p13 = scmp.ne.s32.totalorder %s6417_s11, %s5306_s7  ;;  %p5313_p2 = scmp.lt.u32.totalorder %s5306_s7, %s6417_s11 }
 0x10d   : > { %p5309_p11 = pnand %p5307_p13, %p6475_p8 }
 0x10f   : > { %p5310_p7 = pneg %p5309_p11 }
 0x111   : > { %p5315_p1 = pnand %p5313_p2, %p5310_p7 }
 0x113   : > { %5318 = shalt.err (!%p5315_p1)
}
 0x114   : > { %s5319_s30 = scalar_lea.vmem %s439_s9, 128  ;;  %p5327_p0 = scmp.lt.s32.totalorder %s439_s9, %s439_s9 }
 0x115   : > { %p5320_p4 = scmp.ne.s32.totalorder %s439_s9, %s5319_s30  ;;  %p5328_p5 = scmp.lt.s32.totalorder %s5319_s30, %s5319_s30 }
 0x117   : > { %p5322_p10 = pnand %p5320_p4, %p6475_p8  ;;  %p5329_p9 = por %p5328_p5, %p5327_p0 }
 0x119   : > { %p5323_p12 = pneg %p5322_p10 }
 0x11b   : > { %p5330_p3 = pnand %p5329_p9, %p5323_p12 }
 0x11d   : > { %5333 = shalt.err (!%p5330_p3)
}
 0x11e   : > { %4587 = dma.hbm_to_vmem [thread:$0]  (!%p6476_p6), %s6417_s11, 128, %s439_s9, [#allocation22]  }
 0x11f   : > { %s474_s25 = scalar_lea.vmem [#allocation17], %s5737_s26  ;;  %s5334_s14 = scalar_lea.hbm %s5755_s28, 4096 }
 0x120   : > { %s481_s10 = sshll.u32 %s474_s25, 4  ;;  %p5335_p8 = scmp.ne.s32.totalorder %s5755_s28, %s5334_s14  ;;  %s5891_s10 = int_to_ptr.vmem [resolvable:$true] %s481_s10 }
 0x121   : > { %p6477_p13 = scmp.ne.s32.totalorder %s6472_s21, 0  ;;  %s5339_s5 = scalar_lea.hbm %s6414_s8, 8192 }
 0x122   : > { %p5340_p2 = scmp.lt.u32.totalorder %s5755_s28, %s6414_s8  ;;  %p5341_p1 = scmp.lt.u32.totalorder %s5339_s5, %s5334_s14 }
 0x123   : > { %p5337_p11 = pnand %p5335_p8, %p6477_p13  ;;  %p5343_p6 = scmp.lt.u32.totalorder %s5334_s14, %s5755_s28 }
 0x124   : > { %p5342_p4 = por %p5341_p1, %p5340_p2 }
 0x125   : > { %p5338_p7 = pneg %p5337_p11 }
 0x126   : > { %p5344_p10 = por %p5343_p6, %p5342_p4 }
 0x128   : > { %p5345_p12 = pnand %p5344_p10, %p5338_p7 }
 0x12a   : > { %5348 = shalt.err (!%p5345_p12)
}
 0x12b   : > { %s5349_s9 = scalar_lea.vmem %s5891_s10, 4096  ;;  %s5502_s3 = smov [#allocation17]  }
 0x12c   : > { %p5350_p0 = scmp.ne.s32.totalorder %s5891_s10, %s5349_s9  ;;  %s5354_s29 = sshll.u32 %s5502_s3, 4  ;;  %s5355_s29 = int_to_ptr.vmem [resolvable:$false] %s5354_s29 }
 0x12d   : > { %s5356_s19 = scalar_lea.vmem %s5355_s29, 8192  ;;  %p5357_p3 = scmp.lt.s32.totalorder %s5891_s10, %s5355_s29 }
 0x12e   : > { %p5352_p5 = pnand %p5350_p0, %p6477_p13  ;;  %p5358_p8 = scmp.lt.s32.totalorder %s5356_s19, %s5349_s9 }
 0x130   : > { %p5353_p9 = pneg %p5352_p5  ;;  %p5359_p11 = por %p5358_p8, %p5357_p3 }
 0x132   : > { %p5360_p2 = pnand %p5359_p11, %p5353_p9 }
 0x134   : > { %5363 = shalt.err (!%p5360_p2)
}
 0x135   : > { %p6478_p7 = scmp.ne.s32.totalorder %s6471_s20, 0  ;;  %s4449_s18 = sshll.u32 %s5486_s24, 12 }
 0x136   : > { %s495_s30 = scalar_lea.vmem [#allocation18], %s5737_s26  ;;  %s6479_s14 = sld [smem:[#allocation44_spill]] }
 0x137   : > { %4594 = dma.hbm_to_vmem [thread:$0]  (!%p6478_p7), %s5755_s28, 4096, %s5891_s10, %s5759_s15, %s5495_s1, %s6474_s16, %s6473_s12  }
 0x138   : > { %s503_s22 = sshll.u32 %s495_s30, 4  ;;  %s6480_s23 = sand.u32 1, %s5486_s24   ;;  %s5925_s22 = int_to_ptr.vmem [resolvable:$true] %s503_s22 }
 0x139   : > { %s5929_s5 = scalar_lea.sflag [#allocation19], %s6480_s23 }
 0x13c   : > { %s5923_s13 = scalar_lea.hbm %s6479_s14, %s4449_s18  ;;  %s5369_s15 = scalar_lea.hbm %s6479_s14, 8192 }
 0x13d   : > { %s5364_s27 = scalar_lea.hbm %s5923_s13, 4096  ;;  %p5370_p10 = scmp.lt.u32.totalorder %s5923_s13, %s6479_s14 }
 0x13e   : > { %p5365_p1 = scmp.ne.s32.totalorder %s5923_s13, %s5364_s27  ;;  %p5371_p12 = scmp.lt.u32.totalorder %s5369_s15, %s5364_s27 }
 0x13f   : > { %p5373_p5 = scmp.lt.u32.totalorder %s5364_s27, %s5923_s13 }
 0x140   : > { %p5367_p4 = pnand %p5365_p1, %p6477_p13  ;;  %p5372_p0 = por %p5371_p12, %p5370_p10 }
 0x142   : > { %p5368_p6 = pneg %p5367_p4  ;;  %p5374_p9 = por %p5373_p5, %p5372_p0 }
 0x144   : > { %p5375_p3 = pnand %p5374_p9, %p5368_p6 }
 0x146   : > { %5378 = shalt.err (!%p5375_p3)
}
 0x147   : > { %s5379_s24 = scalar_lea.vmem %s5925_s22, 4096  ;;  %s5503_s7 = smov [#allocation18]  }
 0x148   : > { %p5380_p8 = scmp.ne.s32.totalorder %s5925_s22, %s5379_s24  ;;  %s5384_s9 = sshll.u32 %s5503_s7, 4  ;;  %s5385_s9 = int_to_ptr.vmem [resolvable:$false] %s5384_s9 }
 0x149   : > { %s5386_s3 = scalar_lea.vmem %s5385_s9, 8192  ;;  %p5387_p1 = scmp.lt.s32.totalorder %s5925_s22, %s5385_s9 }
 0x14a   : > { %p5382_p11 = pnand %p5380_p8, %p6477_p13  ;;  %p5388_p4 = scmp.lt.s32.totalorder %s5386_s3, %s5379_s24 }
 0x14c   : > { %p5383_p2 = pneg %p5382_p11  ;;  %p5389_p10 = por %p5388_p4, %p5387_p1 }
 0x14e   : > { %p5390_p12 = pnand %p5389_p10, %p5383_p2 }
 0x150   : > { %5393 = shalt.err (!%p5390_p12)
}
 0x151   : > { %4597 = dma.hbm_to_vmem [thread:$0]  (!%p6478_p7), %s5923_s13, 4096, %s5925_s22, %s5929_s5, %s6474_s16, %s6474_s16, %s6473_s12  }
 0x152   : > { %s6481_s21 = sld [smem:[#allocation36_spill]] }
 0x158   : > { %p6482_p13 = scmp.ne.s32.totalorder %s6481_s21, 0 }
 0x159   : > { %s6483_s29 = sld [smem:[#allocation35_spill]] (!%p6482_p13) }
 0x15a   : > { %515 = sbr.rel (%p6482_p13) target bundleno = 2501 (0x9c5), region = 68 }
 0x15f   : > { %p6484_p6 = scmp.eq.s32.totalorder (!%p6482_p13), %s6483_s29, 0 }
 0x161   : > { %5437 = dma.done.wait (%p6484_p6), [#allocation4], 512   ;;  %p6485_p0 = pmov %p6484_p6 }
 0x163   : > { %5439 = vsyncadd (%p6485_p0), [#allocation4], 4294966784  ;;  %p6486_p5 = pmov %p6485_p0 }
 0x164   : > { %p6487_p9 = pmov %p6485_p0 }
 0x165   : > { %5441 = dma.done.wait (%p6486_p5), [#allocation7], 64  }
 0x166   : > { %5443 = vsyncadd (%p6487_p9), [#allocation7], 4294967232  ;;  %p6488_p3 = pmov %p6485_p0 }
 0x167   : > { %p6489_p7 = pmov %p6485_p0 }
 0x168   : > { %5445 = dma.done.wait (%p6488_p3), [#allocation10], 8192  }
 0x169   : > { %5447 = vsyncadd (%p6489_p7), [#allocation10], 4294959104  ;;  %p6490_p8 = pmov %p6485_p0 }
 0x16a   : > { %p6491_p11 = pmov %p6485_p0 }
 0x16b   : > { %5449 = dma.done.wait (%p6490_p8), [#allocation13], 8192  }
 0x16c   : > { %5451 = vsyncadd (%p6491_p11), [#allocation13], 4294959104  ;;  %s6492_s20 = sld [smem:[#allocation33_spill]]  ;;  %s6493_s12 = sld [smem:[#allocation39_spill]] }
 0x16d   : > { %s545_s16 = sand.u32 1, %s6483_s29  }
 0x16e   : > { %s546_s30 = scalar_lea.sflag [#allocation16], %s545_s16 }
 0x172   : > { %s547_s19 = sand.u32 1, %s6492_s20   ;;  %p6494_p2 = scmp.ne.s32.totalorder %s6493_s12, 0 }
 0x173   : > { %s4184_s18 = sshll.u32 %s547_s19, 8 }
 0x174   : > { %s5976_s22 = scalar_lea.vmem [#allocation15], %s4184_s18 }
 0x175   : > { %5453 = dma.done.wait (%p6494_p2), %s546_s30, 8192  }
 0x176   : > { %5455 = vsyncadd (%p6494_p2), %s546_s30, 4294959104  ;;  %s5982_s17 = scalar_lea.vmem [#allocation17], %s4184_s18  ;;  %s564_s25 = scalar_lea.sflag [#allocation19], %s545_s16 }
 0x177   : > { %s5984_s13 = scalar_lea.vmem [#allocation18], %s4184_s18 }
 0x178   : > { %5457 = dma.done.wait (%p6494_p2), %s564_s25, 4096  }
 0x179   : > { %5459 = vsyncadd (%p6494_p2), %s564_s25, 4294963200  ;;  %p6495_p1 = pmov %p6485_p0 }
 0x17a   : > { %p6496_p4 = pmov %p6485_p0 }
 0x17b   : > { %5461 = dma.done.wait (%p6495_p1), [#allocation19], 128  }
 0x17c   : > { %5463 = vsyncadd (%p6496_p4), [#allocation19], 4294967168  ;;  %p6497_p10 = pmov %p6485_p0 }
 0x17d   : > { %p6498_p12 = pmov %p6485_p0 }
 0x17e   : > { %5465 = dma.done.wait (%p6497_p10), [#allocation22], 128  }
 0x17f   : > { %5467 = vsyncadd (%p6498_p12), [#allocation22], 4294967168  ;;  %p6499_p13 = scmp.ne.s32.totalorder %s6483_s29, 0 }
 0x180   : > { %v6000_v0 = vld [vmem:[#allocation3] sm:$0xff] (!%p6499_p13)  ;;  %v6002_v1 = vld [vmem:[#allocation3 + $0x8] sm:$0xff] (!%p6499_p13)  ;;  %v6004_v2 = vld [vmem:[#allocation3 + $0x10] sm:$0xff] (!%p6499_p13)  ;;  %s5507_s23 = smov (!%p6499_p13), 64   ;;  %vm5508_vm0 = vmmov (!%p6499_p13), 0   ;;  %vm2346_vm1 = vcmask (!%p6499_p13), 1043456  }
 0x181   : > { %628 = sbr.rel (%p6499_p13) target bundleno = 1941 (0x795), region = 120  ;;  %v633_v3 = vmul.f32 (!%p6499_p13), %v6000_v0, %v6000_v0  ;;  %v634_v4 = vmul.f32 (!%p6499_p13), %v6002_v1, %v6002_v1  ;;  %v6010_v5 = vld [vmem:[#allocation3 + $0x18] sm:$0xff] (!%p6499_p13)  ;;  %v635_v6 = vmul.f32 (!%p6499_p13), %v6004_v2, %v6004_v2  ;;  %v4672_v8 = vld [vmem:[#allocation9 + $0x4] ss:$8 sps:$4 sm:$0xff] (!%p6499_p13)   ;;  %v4674_v9 = vld [vmem:[#allocation9] ss:$8 sps:$4 sm:$0xff] (!%p6499_p13)  }
 0x182   : > { %v636_v7 = vmul.f32 (!%p6499_p13), %v6010_v5, %v6010_v5  ;;  %v4675_v11 = vld [vmem:[#allocation11 + $0x4] ss:$8 sps:$4 sm:$0xff] (!%p6499_p13)   ;;  %v4677_v12 = vld [vmem:[#allocation11] ss:$8 sps:$4 sm:$0xff] (!%p6499_p13)   ;;  %864 = vmatprep.subr.bf16.mxu0 (!%p6499_p13), %v4672_v8  ;;  %v4678_v13 = vld [vmem:[#allocation9 + $0x14] ss:$8 sps:$4 sm:$0xff] (!%p6499_p13)  }
 0x183   : > { %v637_v10 = vadd.f32 (!%p6499_p13), %v634_v4, %v633_v3  ;;  %865 = vmatpush1.bf16.msra.mxu0 (!%p6499_p13), %v4674_v9  ;;  %v4680_v15 = vld [vmem:[#allocation9 + $0x10] ss:$8 sps:$4 sm:$0xff] (!%p6499_p13)   ;;  %1099 = vmatprep.subr.bf16.mxu1 (!%p6499_p13), %v4675_v11  ;;  %v4681_v16 = vld [vmem:[#allocation11 + $0x14] ss:$8 sps:$4 sm:$0xff] (!%p6499_p13)   ;;  %v4684_v18 = vld [vmem:[#allocation9 + $0x24] ss:$8 sps:$4 sm:$0xff] (!%p6499_p13)  }
 0x184   : > { %v640_v14 = vadd.f32 (!%p6499_p13), %v636_v7, %v635_v6  ;;  %866 = vmatprep.subr.bf16.mxu0 (!%p6499_p13), %v4678_v13  ;;  %1100 = vmatpush1.bf16.msra.mxu1 (!%p6499_p13), %v4677_v12  ;;  %v4683_v17 = vld [vmem:[#allocation11 + $0x10] ss:$8 sps:$4 sm:$0xff] (!%p6499_p13)   ;;  %v4687_v19 = vld [vmem:[#allocation11 + $0x24] ss:$8 sps:$4 sm:$0xff] (!%p6499_p13)   ;;  %v4686_v20 = vld [vmem:[#allocation9 + $0x20] ss:$8 sps:$4 sm:$0xff] (!%p6499_p13)  }
 0x185   : > { %638 = vadd.xlane.f32.xlu0 (!%p6499_p13), %v637_v10  ;;  %1101 = vmatprep.subr.bf16.mxu1 (!%p6499_p13), %v4681_v16  ;;  %v4690_v21 = vld [vmem:[#allocation9 + $0x34] ss:$8 sps:$4 sm:$0xff] (!%p6499_p13)   ;;  %v4689_v22 = vld [vmem:[#allocation11 + $0x20] ss:$8 sps:$4 sm:$0xff] (!%p6499_p13)   ;;  %v4692_v24 = vld [vmem:[#allocation9 + $0x30] ss:$8 sps:$4 sm:$0xff] (!%p6499_p13)  }
 0x186   : > { %v4693_v23 = vld [vmem:[#allocation11 + $0x34] ss:$8 sps:$4 sm:$0xff] (!%p6499_p13)   ;;  %v4696_v25 = vld [vmem:[#allocation9 + $0x44] ss:$8 sps:$4 sm:$0xff] (!%p6499_p13)   ;;  %v4695_v26 = vld [vmem:[#allocation11 + $0x30] ss:$8 sps:$4 sm:$0xff] (!%p6499_p13)  }
 0x187   : > { %867 = vmatpush1.bf16.msra.mxu0 (!%p6499_p13), %v4680_v15  ;;  %v4699_v27 = vld [vmem:[#allocation11 + $0x44] ss:$8 sps:$4 sm:$0xff] (!%p6499_p13)   ;;  %v4698_v28 = vld [vmem:[#allocation9 + $0x40] ss:$8 sps:$4 sm:$0xff] (!%p6499_p13)   ;;  %v4702_v29 = vld [vmem:[#allocation9 + $0x54] ss:$8 sps:$4 sm:$0xff] (!%p6499_p13)  }
 0x188   : > { %868 = vmatprep.subr.bf16.mxu0 %v4684_v18  ;;  %1102 = vmatpush1.bf16.msra.mxu1 %v4683_v17  ;;  %v4701_v30 = vld [vmem:[#allocation11 + $0x40] ss:$8 sps:$4 sm:$0xff]   ;;  %v4705_v31 = vld [vmem:[#allocation11 + $0x54] ss:$8 sps:$4 sm:$0xff]   ;;  %v4704_v32 = vld [vmem:[#allocation9 + $0x50] ss:$8 sps:$4 sm:$0xff]  }
 0x189   : > { %641 = vadd.xlane.f32.xlu0 %v640_v14  ;;  %1103 = vmatprep.subr.bf16.mxu1 %v4687_v19  ;;  %v4708_v33 = vld [vmem:[#allocation9 + $0x64] ss:$8 sps:$4 sm:$0xff]   ;;  %v4707_v34 = vld [vmem:[#allocation11 + $0x50] ss:$8 sps:$4 sm:$0xff]   ;;  %v4710_v36 = vld [vmem:[#allocation9 + $0x60] ss:$8 sps:$4 sm:$0xff]  }
 0x18a   : > { %v4711_v35 = vld [vmem:[#allocation11 + $0x64] ss:$8 sps:$4 sm:$0xff]   ;;  %v4714_v37 = vld [vmem:[#allocation9 + $0x74] ss:$8 sps:$4 sm:$0xff]   ;;  %v4713_v38 = vld [vmem:[#allocation11 + $0x60] ss:$8 sps:$4 sm:$0xff]  }
 0x18b   : > { %869 = vmatpush1.bf16.msra.mxu0 %v4686_v20  ;;  %v4717_v39 = vld [vmem:[#allocation11 + $0x74] ss:$8 sps:$4 sm:$0xff]   ;;  %v4716_v40 = vld [vmem:[#allocation9 + $0x70] ss:$8 sps:$4 sm:$0xff]   ;;  %v4720_v41 = vld [vmem:[#allocation9 + $0x84] ss:$8 sps:$4 sm:$0xff]   ;;  %v656_v20 = vlaneseq }
 0x18c   : > { %870 = vmatprep.subr.bf16.mxu0 %v4690_v21  ;;  %1104 = vmatpush1.bf16.msra.mxu1 %v4689_v22  ;;  %v4719_v42 = vld [vmem:[#allocation11 + $0x70] ss:$8 sps:$4 sm:$0xff]   ;;  %v4723_v43 = vld [vmem:[#allocation11 + $0x84] ss:$8 sps:$4 sm:$0xff]   ;;  %v4722_v44 = vld [vmem:[#allocation9 + $0x80] ss:$8 sps:$4 sm:$0xff]  }
 0x18d   : > { %1105 = vmatprep.subr.bf16.mxu1 %v4693_v23  ;;  %v4726_v45 = vld [vmem:[#allocation9 + $0x94] ss:$8 sps:$4 sm:$0xff]   ;;  %v4725_v46 = vld [vmem:[#allocation11 + $0x80] ss:$8 sps:$4 sm:$0xff]   ;;  %v4728_v48 = vld [vmem:[#allocation9 + $0x90] ss:$8 sps:$4 sm:$0xff]  }
 0x18e   : > { %v4729_v47 = vld [vmem:[#allocation11 + $0x94] ss:$8 sps:$4 sm:$0xff]   ;;  %v4732_v49 = vld [vmem:[#allocation9 + $0xa4] ss:$8 sps:$4 sm:$0xff]   ;;  %v4731_v50 = vld [vmem:[#allocation11 + $0x90] ss:$8 sps:$4 sm:$0xff]  }
 0x18f   : > { %871 = vmatpush1.bf16.msra.mxu0 %v4692_v24  ;;  %v4735_v51 = vld [vmem:[#allocation11 + $0xa4] ss:$8 sps:$4 sm:$0xff]   ;;  %v4734_v52 = vld [vmem:[#allocation9 + $0xa0] ss:$8 sps:$4 sm:$0xff]   ;;  %v4738_v53 = vld [vmem:[#allocation9 + $0xb4] ss:$8 sps:$4 sm:$0xff]  }
 0x190   : > { %872 = vmatprep.subr.bf16.mxu0 %v4696_v25  ;;  %1106 = vmatpush1.bf16.msra.mxu1 %v4695_v26  ;;  %v4737_v54 = vld [vmem:[#allocation11 + $0xa0] ss:$8 sps:$4 sm:$0xff]   ;;  %v4741_v55 = vld [vmem:[#allocation11 + $0xb4] ss:$8 sps:$4 sm:$0xff]   ;;  %v4740_v56 = vld [vmem:[#allocation9 + $0xb0] ss:$8 sps:$4 sm:$0xff]  }
 0x191   : > { %1107 = vmatprep.subr.bf16.mxu1 %v4699_v27  ;;  %v4743_v57 = vld [vmem:[#allocation11 + $0xb0] ss:$8 sps:$4 sm:$0xff]   ;;  %v4744_v58 = vld [vmem:[#allocation9 + $0xc4] ss:$8 sps:$4 sm:$0xff]   ;;  %v4746_v59 = vld [vmem:[#allocation9 + $0xc0] ss:$8 sps:$4 sm:$0xff]  }
 0x192   : > { %v4747_v60 = vld [vmem:[#allocation11 + $0xc4] ss:$8 sps:$4 sm:$0xff]   ;;  %v4749_v61 = vld [vmem:[#allocation11 + $0xc0] ss:$8 sps:$4 sm:$0xff]   ;;  %v4750_v62 = vld [vmem:[#allocation9 + $0xd4] ss:$8 sps:$4 sm:$0xff]  }
 0x193   : > { %873 = vmatpush1.bf16.msra.mxu0 %v4698_v28  ;;  %v4753_v63 = vld [vmem:[#allocation11 + $0xd4] ss:$8 sps:$4 sm:$0xff]   ;;  %v4752_v3 = vld [vmem:[#allocation9 + $0xd0] ss:$8 sps:$4 sm:$0xff]   ;;  %v4756_v6 = vld [vmem:[#allocation9 + $0xe4] ss:$8 sps:$4 sm:$0xff]  }
 0x194   : > { %874 = vmatprep.subr.bf16.mxu0 %v4702_v29  ;;  %1108 = vmatpush1.bf16.msra.mxu1 %v4701_v30  ;;  %v4755_v4 = vld [vmem:[#allocation11 + $0xd0] ss:$8 sps:$4 sm:$0xff]   ;;  %v4759_v7 = vld [vmem:[#allocation11 + $0xe4] ss:$8 sps:$4 sm:$0xff]   ;;  %v4758_v8 = vld [vmem:[#allocation9 + $0xe0] ss:$8 sps:$4 sm:$0xff]  }
 0x195   : > { %1109 = vmatprep.subr.bf16.mxu1 %v4705_v31  ;;  %v4761_v9 = vld [vmem:[#allocation11 + $0xe0] ss:$8 sps:$4 sm:$0xff]   ;;  %v4762_v10 = vld [vmem:[#allocation9 + $0xf4] ss:$8 sps:$4 sm:$0xff]   ;;  %v4764_v12 = vld [vmem:[#allocation9 + $0xf0] ss:$8 sps:$4 sm:$0xff]  }
 0x196   : > { %v4765_v11 = vld [vmem:[#allocation11 + $0xf4] ss:$8 sps:$4 sm:$0xff]   ;;  %v4767_v13 = vld [vmem:[#allocation11 + $0xf0] ss:$8 sps:$4 sm:$0xff]   ;;  %v4770_v14 = vld [vmem:[#allocation12 + $0x4] ss:$8 sps:$4 sm:$0xff]  }
 0x197   : > { %875 = vmatpush1.bf16.msra.mxu0 %v4704_v32  ;;  %v6017_v22 = vshrl.u32 %v656_v20, 7  ;;  %v654_v26 = vld [vmem:[#allocation6] sm:$0x3]  ;;  %vm2302_vm3 = vcmask 64512  }
 0x198   : > { %876 = vmatprep.subr.bf16.mxu0 %v4708_v33  ;;  %1110 = vmatpush1.bf16.msra.mxu1 %v4707_v34 }
 0x199   : > { %1111 = vmatprep.subr.bf16.mxu1 %v4711_v35  ;;  %v662_v23 = vsub.s32 1, %v6017_v22  ;;  %v658_v24 = vsub.s32 0, %v6017_v22 }
 0x19b   : > { %877 = vmatpush1.bf16.msra.mxu0 %v4710_v36  ;;  %v663_v28 = vrot.slane %v654_v26, %v662_v23  ;;  %v659_v30 = vrot.slane %v654_v26, %v658_v24 }
 0x19c   : > { %878 = vmatprep.subr.bf16.mxu0 %v4714_v37  ;;  %1112 = vmatpush1.bf16.msra.mxu1 %v4713_v38 }
 0x19d   : > { %1113 = vmatprep.subr.bf16.mxu1 %v4717_v39  ;;  %v4768_v39 = vld [vmem:[#allocation12] ss:$8 sps:$4 sm:$0xff]  }
 0x19f   : > { %879 = vmatpush1.bf16.msra.mxu0 %v4716_v40  ;;  %v4773_v40 = vld [vmem:[#allocation12 + $0x14] ss:$8 sps:$4 sm:$0xff]  }
 0x1a0   : > { %880 = vmatprep.subr.bf16.mxu0 %v4720_v41  ;;  %1114 = vmatpush1.bf16.msra.mxu1 %v4719_v42  ;;  %v4779_v41 = vld [vmem:[#allocation12 + $0x34] ss:$8 sps:$4 sm:$0xff]   ;;  %v4777_v42 = vld [vmem:[#allocation12 + $0x30] ss:$8 sps:$4 sm:$0xff]  }
 0x1a1   : > { %1115 = vmatprep.subr.bf16.mxu1 %v4723_v43  ;;  %v4782_v43 = vld [vmem:[#allocation12 + $0x44] ss:$8 sps:$4 sm:$0xff]  }
 0x1a3   : > { %881 = vmatpush1.bf16.msra.mxu0 %v4722_v44  ;;  %v4780_v44 = vld [vmem:[#allocation12 + $0x40] ss:$8 sps:$4 sm:$0xff]  }
 0x1a4   : > { %882 = vmatprep.subr.bf16.mxu0 %v4726_v45  ;;  %1116 = vmatpush1.bf16.msra.mxu1 %v4725_v46  ;;  %v4785_v45 = vld [vmem:[#allocation12 + $0x54] ss:$8 sps:$4 sm:$0xff]   ;;  %v4783_v46 = vld [vmem:[#allocation12 + $0x50] ss:$8 sps:$4 sm:$0xff]  }
 0x1a5   : > { %1117 = vmatprep.subr.bf16.mxu1 %v4729_v47  ;;  %v4788_v47 = vld [vmem:[#allocation12 + $0x64] ss:$8 sps:$4 sm:$0xff]  }
 0x1a7   : > { %883 = vmatpush1.bf16.msra.mxu0 %v4728_v48  ;;  %v4786_v48 = vld [vmem:[#allocation12 + $0x60] ss:$8 sps:$4 sm:$0xff]  }
 0x1a8   : > { %884 = vmatprep.subr.bf16.mxu0 %v4732_v49  ;;  %1118 = vmatpush1.bf16.msra.mxu1 %v4731_v50  ;;  %v4791_v49 = vld [vmem:[#allocation12 + $0x74] ss:$8 sps:$4 sm:$0xff]   ;;  %v4789_v50 = vld [vmem:[#allocation12 + $0x70] ss:$8 sps:$4 sm:$0xff]  }
 0x1a9   : > { %1119 = vmatprep.subr.bf16.mxu1 %v4735_v51  ;;  %v4794_v51 = vld [vmem:[#allocation12 + $0x84] ss:$8 sps:$4 sm:$0xff]  }
 0x1ab   : > { %885 = vmatpush1.bf16.msra.mxu0 %v4734_v52  ;;  %v4792_v52 = vld [vmem:[#allocation12 + $0x80] ss:$8 sps:$4 sm:$0xff]  }
 0x1ac   : > { %886 = vmatprep.subr.bf16.mxu0 %v4738_v53  ;;  %1120 = vmatpush1.bf16.msra.mxu1 %v4737_v54  ;;  %v4797_v53 = vld [vmem:[#allocation12 + $0x94] ss:$8 sps:$4 sm:$0xff]   ;;  %v4795_v54 = vld [vmem:[#allocation12 + $0x90] ss:$8 sps:$4 sm:$0xff]  }
 0x1ad   : > { %1121 = vmatprep.subr.bf16.mxu1 %v4741_v55  ;;  %v4800_v55 = vld [vmem:[#allocation12 + $0xa4] ss:$8 sps:$4 sm:$0xff]  }
 0x1af   : > { %887 = vmatpush1.bf16.msra.mxu0 %v4740_v56  ;;  %v4798_v56 = vld [vmem:[#allocation12 + $0xa0] ss:$8 sps:$4 sm:$0xff]  }
 0x1b0   : > { %888 = vmatprep.subr.bf16.mxu0 %v4744_v58  ;;  %1122 = vmatpush1.bf16.msra.mxu1 %v4743_v57  ;;  %v4803_v57 = vld [vmem:[#allocation12 + $0xb4] ss:$8 sps:$4 sm:$0xff]   ;;  %v4801_v58 = vld [vmem:[#allocation12 + $0xb0] ss:$8 sps:$4 sm:$0xff]  }
 0x1b1   : > { %1123 = vmatprep.subr.bf16.mxu1 %v4747_v60  ;;  %v4804_v60 = vld [vmem:[#allocation12 + $0xc0] ss:$8 sps:$4 sm:$0xff]  }
 0x1b3   : > { %889 = vmatpush1.bf16.msra.mxu0 %v4746_v59  ;;  %v4806_v59 = vld [vmem:[#allocation12 + $0xc4] ss:$8 sps:$4 sm:$0xff]  }
 0x1b4   : > { %890 = vmatprep.subr.bf16.mxu0 %v4750_v62  ;;  %1124 = vmatpush1.bf16.msra.mxu1 %v4749_v61  ;;  %v4809_v61 = vld [vmem:[#allocation12 + $0xd4] ss:$8 sps:$4 sm:$0xff]   ;;  %v4807_v62 = vld [vmem:[#allocation12 + $0xd0] ss:$8 sps:$4 sm:$0xff]  }
 0x1b5   : > { %1125 = vmatprep.subr.bf16.mxu1 %v4753_v63  ;;  %v4812_v63 = vld [vmem:[#allocation12 + $0xe4] ss:$8 sps:$4 sm:$0xff]  }
 0x1b7   : > { %891 = vmatpush1.bf16.msra.mxu0 %v4752_v3  ;;  %v4810_v3 = vld [vmem:[#allocation12 + $0xe0] ss:$8 sps:$4 sm:$0xff]  }
 0x1b8   : > { %892 = vmatprep.subr.bf16.mxu0 %v4756_v6  ;;  %1126 = vmatpush1.bf16.msra.mxu1 %v4755_v4  ;;  %v4815_v4 = vld [vmem:[#allocation12 + $0xf4] ss:$8 sps:$4 sm:$0xff]   ;;  %v4813_v6 = vld [vmem:[#allocation12 + $0xf0] ss:$8 sps:$4 sm:$0xff]  }
 0x1b9   : > { %1127 = vmatprep.subr.bf16.mxu1 %v4759_v7  ;;  %v5504_v7 = vmov 0.0  }
 0x1bb   : > { %893 = vmatpush1.bf16.msra.mxu0 %v4758_v8  ;;  %v5505_v8 = vmov 1983009808  }
 0x1bc   : > { %894 = vmatprep.subr.bf16.mxu0 %v4762_v10  ;;  %1128 = vmatpush1.bf16.msra.mxu1 %v4761_v9  ;;  %v1379_v9 = vunpack.c.l.s4 %v5505_v8  ;;  %v5506_v10 = vmov 1934713408  }
 0x1bd   : > { %1129 = vmatprep.subr.bf16.mxu1 %v4765_v11  ;;  %v1410_v11 = vunpack.c.l.s4 %v5506_v10 }
 0x1bf   : > { %895 = vmatpush1.bf16.msra.mxu0 %v4764_v12  ;;  %v1380_v12 = vunpack.c.0.s8 %v1379_v9 }
 0x1c0   : > { %1334 = vmatprep.subr.bf16.mxu0 %v4770_v14  ;;  %1130 = vmatpush1.bf16.msra.mxu1 %v4767_v13  ;;  %v1411_v13 = vunpack.c.0.s8 %v1410_v11 }
 0x1c1   : > { %4466 = vmatprep.subr.bf16.mxu1 %v5504_v7  ;;  %v6036_v14 = vsub.s32 %v1380_v12, %v6017_v22 }
 0x212   : > { %v639_v15 = vpop.xlane.xlu0 %638 }
 0x213   : > { %v644_v16 = vmul.f32 0.00390625, %v639_v15  ;;  %v6039_v15 = vsub.s32 %v1411_v13, %v6017_v22 }
 0x215   : > { %v646_v17 = vadd.f32 1e-06, %v644_v16 }
 0x216   : > { %v642_v18 = vpop.xlane.xlu0 %641 }
 0x217   : > { %4864 = vrsqrt.f32 %v646_v17  ;;  %v645_v19 = vmul.f32 0.00390625, %v642_v18 }
 0x219   : > { %v647_v21 = vadd.f32 1e-06, %v645_v19 }
 0x21b   : > { %4866 = vrsqrt.f32 %v647_v21 }
 0x221   : > { %v4865_v25 = vpop.eup %4864 }
 0x222   : > { %v651_v27 = vmul.f32 %v4865_v25, %v6002_v1  ;;  %v650_v29 = vmul.f32 %v4865_v25, %v6000_v0  ;;  %v4771_v0 = vld [vmem:[#allocation12 + $0x10] ss:$8 sps:$4 sm:$0xff]  }
 0x224   : > { %v667_v34 = vmul.f32 %v663_v28, %v651_v27  ;;  %v666_v36 = vmul.f32 %v659_v30, %v650_v29 }
 0x225   : > { %v4867_v31 = vpop.eup %4866 }
 0x226   : > { %v653_v32 = vmul.f32 %v4867_v31, %v6010_v5  ;;  %v652_v33 = vmul.f32 %v4867_v31, %v6004_v2  ;;  %v4776_v2 = vld [vmem:[#allocation12 + $0x24] ss:$8 sps:$4 sm:$0xff]   ;;  %v4774_v5 = vld [vmem:[#allocation12 + $0x20] ss:$8 sps:$4 sm:$0xff]  }
 0x228   : > { %v669_v35 = vmul.f32 %v663_v28, %v653_v32  ;;  %v668_v37 = vmul.f32 %v659_v30, %v652_v33 }
 0x22a   : > { %v671_v38 = vpack.c.bf16 %v669_v35, %v667_v34  ;;  %v6029_v1 = vpack.c.bf16 %v668_v37, %v666_v36 }
 0x22c   : > { %896 = vmatprep.mubr.bf16.mxu0 %v671_v38  ;;  %1131 = vmatprep.mubr.bf16.mxu1 %v671_v38 }
 0x22d   : > { %897 = vmatmul.mubr.bf16.vlgmr.msra.gmra.mrb[0].mxu0 %v6029_v1  ;;  %1132 = vmatmul.mubr.bf16.vlgmr.msra.gmra.mrb[0].mxu1 %v6029_v1 }
 0x22e   : > { %1335 = vmatpush1.bf16.msra.mxu0 %v4768_v39  ;;  %1366 = vmatprep.mubr.bf16.mxu0 %v671_v38 }
 0x22f   : > { %1336 = vmatprep.subr.bf16.mxu0 %v4773_v40  ;;  %4468 = vmatprep.mubr.msk.bf16.mxu1 %vm5508_vm0, %v5504_v7 }
 0x232   : > { %1337 = vmatpush1.bf16.msra.mxu0 %v4771_v0 }
 0x233   : > { %1338 = vmatprep.subr.bf16.mxu0 %v4776_v2 }
 0x236   : > { %1339 = vmatpush1.bf16.msra.mxu0 %v4774_v5 }
 0x237   : > { %1340 = vmatprep.subr.bf16.mxu0 %v4779_v41 }
 0x23a   : > { %1341 = vmatpush1.bf16.msra.mxu0 %v4777_v42 }
 0x23b   : > { %1342 = vmatprep.subr.bf16.mxu0 %v4782_v43 }
 0x23e   : > { %1343 = vmatpush1.bf16.msra.mxu0 %v4780_v44 }
 0x23f   : > { %1344 = vmatprep.subr.bf16.mxu0 %v4785_v45 }
 0x242   : > { %1345 = vmatpush1.bf16.msra.mxu0 %v4783_v46 }
 0x243   : > { %1346 = vmatprep.subr.bf16.mxu0 %v4788_v47 }
 0x246   : > { %1347 = vmatpush1.bf16.msra.mxu0 %v4786_v48 }
 0x247   : > { %1348 = vmatprep.subr.bf16.mxu0 %v4791_v49 }
 0x24a   : > { %1349 = vmatpush1.bf16.msra.mxu0 %v4789_v50 }
 0x24b   : > { %1350 = vmatprep.subr.bf16.mxu0 %v4794_v51 }
 0x24e   : > { %1351 = vmatpush1.bf16.msra.mxu0 %v4792_v52 }
 0x24f   : > { %1352 = vmatprep.subr.bf16.mxu0 %v4797_v53 }
 0x252   : > { %1353 = vmatpush1.bf16.msra.mxu0 %v4795_v54 }
 0x253   : > { %1354 = vmatprep.subr.bf16.mxu0 %v4800_v55 }
 0x256   : > { %1355 = vmatpush1.bf16.msra.mxu0 %v4798_v56 }
 0x257   : > { %1356 = vmatprep.subr.bf16.mxu0 %v4803_v57 }
 0x25a   : > { %1357 = vmatpush1.bf16.msra.mxu0 %v4801_v58 }
 0x25b   : > { %1358 = vmatprep.subr.bf16.mxu0 %v4806_v59 }
 0x25e   : > { %1359 = vmatpush1.bf16.msra.mxu0 %v4804_v60 }
 0x25f   : > { %1360 = vmatprep.subr.bf16.mxu0 %v4809_v61 }
 0x262   : > { %1361 = vmatpush1.bf16.msra.mxu0 %v4807_v62 }
 0x263   : > { %1362 = vmatprep.subr.bf16.mxu0 %v4812_v63 }
 0x266   : > { %1363 = vmatpush1.bf16.msra.mxu0 %v4810_v3 }
 0x267   : > { %1364 = vmatprep.subr.bf16.mxu0 %v4815_v4 }
 0x26a   : > { %1365 = vmatpush1.bf16.msra.mxu0 %v4813_v6 }
 0x26d   : > { %1367 = vmatmul.mubr.bf16.vlgmr.msra.gmra.mrb[4].mxu0 %v6029_v1 }
 0x300   : > { %v898_v16 = vpop.f32.mrb[0].mxu0  ;;  %v1133_v17 = vpop.f32.mrb[0].mxu1 }
 0x301   : > { %v1377_v18 = vcombine.high %v898_v16, %v5504_v7  ;;  %v1384_v19 = vrot.slane %v898_v16, %v6036_v14  ;;  %v1609_v21 = vcombine.high %v1133_v17, %v5504_v7  ;;  %v1616_v25 = vrot.slane %v1133_v17, %v6036_v14  ;;  %v900_v26 = vpop.f32.mrb[1].mxu0  ;;  %v1135_v27 = vpop.f32.mrb[1].mxu1 }
 0x302   : > { %v1392_v28 = vcombine.high %v900_v26, %v5504_v7  ;;  %v1399_v29 = vrot.slane %v900_v26, %v6036_v14  ;;  %v1624_v30 = vcombine.high %v1135_v27, %v5504_v7  ;;  %v1631_v31 = vrot.slane %v1135_v27, %v6036_v14  ;;  %v902_v32 = vpop.f32.mrb[2].mxu0  ;;  %v1137_v33 = vpop.f32.mrb[2].mxu1 }
 0x303   : > { %v1391_v34 = vrot.slane %v1377_v18, %v6036_v14  ;;  %v1623_v35 = vrot.slane %v1609_v21, %v6036_v14  ;;  %v1443_v36 = vcombine.high %v902_v32, %v5504_v7  ;;  %v1450_v37 = vrot.slane %v902_v32, %v6036_v14  ;;  %v904_v38 = vpop.f32.mrb[3].mxu0  ;;  %v1139_v39 = vpop.f32.mrb[3].mxu1 }
 0x304   : > { %v1406_v1 = vrot.slane %v1392_v28, %v6036_v14  ;;  %v1407_v40 = vcombine.low %v1384_v19, %v1399_v29  ;;  %v1408_v0 = vcombine.high %v1384_v19, %v1399_v29  ;;  %v1638_v2 = vrot.slane %v1624_v30, %v6036_v14 }
 0x305   : > { %v1639_v5 = vcombine.low %v1616_v25, %v1631_v31  ;;  %v1640_v41 = vcombine.high %v1616_v25, %v1631_v31  ;;  %v1457_v42 = vrot.slane %v1443_v36, %v6036_v14  ;;  %v1675_v43 = vcombine.high %v1137_v33, %v5504_v7 }
 0x306   : > { %v1415_v44 = vrot.slane %v1407_v40, %v6039_v15  ;;  %v1422_v45 = vrot.slane %v1408_v0, %v6039_v15  ;;  %v1423_v46 = vcombine.low %v1391_v34, %v1406_v1  ;;  %v1424_v47 = vcombine.high %v1391_v34, %v1406_v1 }
 0x307   : > { %v1647_v48 = vrot.slane %v1639_v5, %v6039_v15  ;;  %v1654_v49 = vrot.slane %v1640_v41, %v6039_v15  ;;  %v1655_v50 = vcombine.low %v1623_v35, %v1638_v2  ;;  %v1656_v51 = vcombine.high %v1623_v35, %v1638_v2 }
 0x308   : > { %v1431_v52 = vrot.slane %v1423_v46, %v6039_v15  ;;  %v1438_v53 = vrot.slane %v1424_v47, %v6039_v15  ;;  %v1509_v54 = vcombine.low %v1415_v44, %v1422_v45  ;;  %v4286_v55 = vcombine.high %v1415_v44, %v1422_v45 }
 0x309   : > { %v1663_v56 = vrot.slane %v1655_v50, %v6039_v15  ;;  %v1670_v57 = vrot.slane %v1656_v51, %v6039_v15  ;;  %v1741_v58 = vcombine.low %v1647_v48, %v1654_v49  ;;  %v4290_v59 = vcombine.high %v1647_v48, %v1654_v49 }
 0x30a   : > { %v6066_v60 = vrot.slane %v1509_v54, %v6036_v14  ;;  %v6069_v61 = vrot.slane %v4286_v55, %v6036_v14  ;;  %v1525_v62 = vcombine.low %v1431_v52, %v1438_v53  ;;  %v4287_v63 = vcombine.high %v1431_v52, %v1438_v53 }
 0x30b   : > { %v1748_v3 = vrot.slane %v1741_v58, %v6036_v14  ;;  %v1756_v4 = vrot.slane %v4290_v59, %v6036_v14  ;;  %v1757_v6 = vcombine.low %v1663_v56, %v1670_v57  ;;  %v4291_v8 = vcombine.high %v1663_v56, %v1670_v57 }
 0x30c   : > { %v1682_v9 = vrot.slane %v1137_v33, %v6036_v14  ;;  %v1689_v10 = vrot.slane %v1675_v43, %v6036_v14  ;;  %v1458_v11 = vcombine.high %v904_v38, %v5504_v7  ;;  %v1465_v12 = vrot.slane %v904_v38, %v6036_v14 }
 0x30d   : > { %v1690_v13 = vcombine.high %v1139_v39, %v5504_v7  ;;  %v1697_v16 = vrot.slane %v1139_v39, %v6036_v14  ;;  %v1764_v17 = vrot.slane %v1757_v6, %v6036_v14  ;;  %v1772_v18 = vrot.slane %v4291_v8, %v6036_v14 }
 0x30e   : > { %v1472_v19 = vrot.slane %v1458_v11, %v6036_v14  ;;  %v1473_v21 = vcombine.low %v1450_v37, %v1465_v12  ;;  %v1474_v25 = vcombine.high %v1450_v37, %v1465_v12  ;;  %v1773_v26 = vcombine.low %v1748_v3, %v1756_v4 }
 0x30f   : > { %v1704_v27 = vrot.slane %v1690_v13, %v6036_v14  ;;  %v1705_v28 = vcombine.low %v1682_v9, %v1697_v16  ;;  %v1706_v29 = vcombine.high %v1682_v9, %v1697_v16  ;;  %v1781_v30 = vcombine.low %v1764_v17, %v1772_v18 }
 0x310   : > { %v1481_v31 = vrot.slane %v1473_v21, %v6039_v15  ;;  %v1488_v32 = vrot.slane %v1474_v25, %v6039_v15  ;;  %v1489_v33 = vcombine.low %v1457_v42, %v1472_v19  ;;  %v1490_v34 = vcombine.high %v1457_v42, %v1472_v19 }
 0x311   : > { %v1713_v35 = vrot.slane %v1705_v28, %v6039_v15  ;;  %v1720_v36 = vrot.slane %v1706_v29, %v6039_v15  ;;  %v1721_v38 = vcombine.low %v1689_v10, %v1704_v27  ;;  %v1722_v39 = vcombine.high %v1689_v10, %v1704_v27 }
 0x312   : > { %v1497_v37 = vrot.slane %v1489_v33, %v6039_v15  ;;  %v1504_v1 = vrot.slane %v1490_v34, %v6039_v15  ;;  %v1559_v40 = vcombine.low %v1481_v31, %v1488_v32  ;;  %v4288_v0 = vcombine.high %v1481_v31, %v1488_v32 }
 0x313   : > { %v1729_v2 = vrot.slane %v1721_v38, %v6039_v15  ;;  %v1736_v5 = vrot.slane %v1722_v39, %v6039_v15  ;;  %v1791_v41 = vcombine.low %v1713_v35, %v1720_v36  ;;  %v4292_v43 = vcombine.high %v1713_v35, %v1720_v36 }
 0x314   : > { %v1566_v42 = vrot.slane %v1559_v40, %v6036_v14  ;;  %v1574_v44 = vrot.slane %v4288_v0, %v6036_v14  ;;  %v1575_v45 = vcombine.low %v1497_v37, %v1504_v1  ;;  %v4289_v46 = vcombine.high %v1497_v37, %v1504_v1 }
 0x315   : > { %v1798_v47 = vrot.slane %v1791_v41, %v6036_v14  ;;  %v1806_v48 = vrot.slane %v4292_v43, %v6036_v14  ;;  %v1807_v49 = vcombine.low %v1729_v2, %v1736_v5  ;;  %v4293_v50 = vcombine.high %v1729_v2, %v1736_v5 }
 0x316   : > { %v1780_v51 = vrot.slane %v1773_v26, %v6039_v15  ;;  %v1788_v52 = vrot.slane %v1781_v30, %v6039_v15  ;;  %v1532_v53 = vrot.slane %v1525_v62, %v6036_v14  ;;  %v1540_v54 = vrot.slane %v4287_v63, %v6036_v14 }
 0x317   : > { %v1541_v55 = vcombine.low %v6066_v60, %v6069_v61  ;;  %v1814_v56 = vrot.slane %v1807_v49, %v6036_v14  ;;  %v1822_v57 = vrot.slane %v4293_v50, %v6036_v14  ;;  %v1823_v58 = vcombine.low %v1798_v47, %v1806_v48 }
 0x318   : > { %v6103_v59 = vcombine.high %v1780_v51, %v1788_v52  ;;  %v6105_v3 = vcombine.low %v1780_v51, %v1788_v52  ;;  %v1549_v4 = vcombine.low %v1532_v53, %v1540_v54  ;;  %v1582_v6 = vrot.slane %v1575_v45, %v6036_v14 }
 0x319   : > { %v1831_v8 = vcombine.low %v1814_v56, %v1822_v57  ;;  %v1590_v62 = vrot.slane %v4289_v46, %v6036_v14  ;;  %v1548_v60 = vrot.slane %v1541_v55, %v6039_v15  ;;  %v1591_v63 = vcombine.low %v1566_v42, %v1574_v44 }
 0x31a   : > { %2109 = vrot.lane.b32.xlu0 %v6103_v59, %s5507_s23  ;;  %2107 = vrot.lane.b32.xlu1 %v6105_v3, %s5507_s23  ;;  %v1556_v61 = vrot.slane %v1549_v4, %v6039_v15  ;;  %v1830_v9 = vrot.slane %v1823_v58, %v6039_v15 }
 0x31b   : > { %v1838_v10 = vrot.slane %v1831_v8, %v6039_v15  ;;  %v1599_v11 = vcombine.low %v1582_v6, %v1590_v62  ;;  %v1598_v16 = vrot.slane %v1591_v63, %v6039_v15 }
 0x31c   : > { %v6115_v12 = vcombine.low %v1548_v60, %v1556_v61  ;;  %v6117_v13 = vcombine.high %v1548_v60, %v1556_v61 }
 0x31d   : > { %v6120_v17 = vcombine.low %v1830_v9, %v1838_v10  ;;  %v1606_v18 = vrot.slane %v1599_v11, %v6039_v15  ;;  %v6123_v19 = vcombine.high %v1830_v9, %v1838_v10 }
 0x31e   : > { %2083 = vrot.lane.b32.xlu1 %v6115_v12, %s5507_s23 }
 0x31f   : > { %v6128_v21 = vcombine.low %v1598_v16, %v1606_v18  ;;  %v6130_v25 = vcombine.high %v1598_v16, %v1606_v18 }
 0x322   : > { %2085 = vrot.lane.b32.xlu1 %v6117_v13, %s5507_s23 }
 0x326   : > { %2111 = vrot.lane.b32.xlu1 %v6120_v17, %s5507_s23 }
 0x32a   : > { %2087 = vrot.lane.b32.xlu1 %v6128_v21, %s5507_s23 }
 0x32e   : > { %2113 = vrot.lane.b32.xlu1 %v6123_v19, %s5507_s23 }
 0x332   : > { %2089 = vrot.lane.b32.xlu1 %v6130_v25, %s5507_s23 }
 0x340   : > { %v1368_v26 = vpop.f32.mrb[4].mxu0 }
 0x341   : > { %v1841_v27 = vcombine.high %v1368_v26, %v5504_v7  ;;  %v1848_v28 = vrot.slane %v1368_v26, %v6036_v14  ;;  %v1370_v29 = vpop.f32.mrb[5].mxu0 }
 0x342   : > { %v1856_v30 = vcombine.high %v1370_v29, %v5504_v7  ;;  %v1863_v31 = vrot.slane %v1370_v29, %v6036_v14  ;;  %v1372_v32 = vpop.f32.mrb[6].mxu0 }
 0x343   : > { %v1855_v33 = vrot.slane %v1841_v27, %v6036_v14  ;;  %v1907_v34 = vcombine.high %v1372_v32, %v5504_v7  ;;  %v1914_v35 = vrot.slane %v1372_v32, %v6036_v14  ;;  %v1374_v36 = vpop.f32.mrb[7].mxu0 }
 0x344   : > { %v1870_v38 = vrot.slane %v1856_v30, %v6036_v14  ;;  %v1871_v39 = vcombine.low %v1848_v28, %v1863_v31  ;;  %v1872_v37 = vcombine.high %v1848_v28, %v1863_v31  ;;  %v1922_v1 = vcombine.high %v1374_v36, %v5504_v7 }
 0x345   : > { %v1921_v40 = vrot.slane %v1907_v34, %v6036_v14  ;;  %v1929_v0 = vrot.slane %v1374_v36, %v6036_v14 }
 0x346   : > { %v1879_v2 = vrot.slane %v1871_v39, %v6039_v15  ;;  %v1886_v5 = vrot.slane %v1872_v37, %v6039_v15  ;;  %v1887_v41 = vcombine.low %v1855_v33, %v1870_v38  ;;  %v1888_v43 = vcombine.high %v1855_v33, %v1870_v38 }
 0x347   : > { %v1936_v42 = vrot.slane %v1922_v1, %v6036_v14  ;;  %v1937_v44 = vcombine.low %v1914_v35, %v1929_v0  ;;  %v1938_v45 = vcombine.high %v1914_v35, %v1929_v0 }
 0x348   : > { %v1895_v46 = vrot.slane %v1887_v41, %v6039_v15  ;;  %v1902_v47 = vrot.slane %v1888_v43, %v6039_v15  ;;  %v1973_v48 = vcombine.low %v1879_v2, %v1886_v5  ;;  %v4294_v49 = vcombine.high %v1879_v2, %v1886_v5  ;;  %v2077_v2 = vld [vmem:[#allocation20] sm:$0xff]  ;;  %v2078_v5 = vld [vmem:[#allocation21] sm:$0xff] }
 0x349   : > { %v1945_v50 = vrot.slane %v1937_v44, %v6039_v15  ;;  %v1952_v51 = vrot.slane %v1938_v45, %v6039_v15  ;;  %v1953_v52 = vcombine.low %v1921_v40, %v1936_v42  ;;  %v1954_v53 = vcombine.high %v1921_v40, %v1936_v42 }
 0x34a   : > { %v1980_v54 = vrot.slane %v1973_v48, %v6036_v14  ;;  %v1988_v55 = vrot.slane %v4294_v49, %v6036_v14  ;;  %v1989_v56 = vcombine.low %v1895_v46, %v1902_v47  ;;  %v4295_v57 = vcombine.high %v1895_v46, %v1902_v47 }
 0x34b   : > { %v1961_v58 = vrot.slane %v1953_v52, %v6039_v15  ;;  %v1968_v4 = vrot.slane %v1954_v53, %v6039_v15  ;;  %v2023_v6 = vcombine.low %v1945_v50, %v1952_v51  ;;  %v4296_v8 = vcombine.high %v1945_v50, %v1952_v51 }
 0x34c   : > { %v1996_v62 = vrot.slane %v1989_v56, %v6036_v14  ;;  %v2004_v60 = vrot.slane %v4295_v57, %v6036_v14  ;;  %v2005_v61 = vcombine.low %v1980_v54, %v1988_v55  ;;  %v2103_v43 = vmul.f32 %v2077_v2, %v6105_v3 }
 0x34d   : > { %v2030_v63 = vrot.slane %v2023_v6, %v6036_v14  ;;  %v2038_v9 = vrot.slane %v4296_v8, %v6036_v14  ;;  %v2039_v10 = vcombine.low %v1961_v58, %v1968_v4  ;;  %v4297_v11 = vcombine.high %v1961_v58, %v1968_v4 }
 0x34e   : > { %v2013_v16 = vcombine.low %v1996_v62, %v2004_v60  ;;  %v2012_v28 = vrot.slane %v2005_v61, %v6039_v15  ;;  %v2079_v50 = vmul.f32 %v2077_v2, %v6115_v12  ;;  %v2104_v51 = vmul.f32 %v2077_v2, %v6103_v59 }
 0x34f   : > { %v2046_v18 = vrot.slane %v2039_v10, %v6036_v14  ;;  %v2054_v26 = vrot.slane %v4297_v11, %v6036_v14  ;;  %v2055_v27 = vcombine.low %v2030_v63, %v2038_v9  ;;  %v2080_v4 = vmul.f32 %v2077_v2, %v6117_v13 }
 0x350   : > { %v2020_v29 = vrot.slane %v2013_v16, %v6039_v15  ;;  %v2105_v6 = vmul.f32 %v2077_v2, %v6120_v17  ;;  %v2081_v10 = vmul.f32 %v2077_v2, %v6128_v21  ;;  %v2106_v13 = vmul.f32 %v2077_v2, %v6123_v19 }
 0x351   : > { %v2063_v30 = vcombine.low %v2046_v18, %v2054_v26  ;;  %v2062_v33 = vrot.slane %v2055_v27, %v6039_v15 }
 0x352   : > { %v6167_v31 = vcombine.low %v2012_v28, %v2020_v29  ;;  %v2022_v32 = vcombine.high %v2012_v28, %v2020_v29  ;;  %v2082_v28 = vmul.f32 %v2077_v2, %v6130_v25  ;;  %v2294_v25 = vand.u32 127, %v656_v20 }
 0x353   : > { %v2070_v34 = vrot.slane %v2063_v30, %v6039_v15 }
 0x354   : > { %v2074_v35 = vpack.c.bf16 %v2022_v32, %v2022_v32  ;;  %v2073_v21 = vpack.c.bf16 %v6167_v31, %v6167_v31  ;;  %vm2295_vm2 = vcmp.le.s32.totalorder %v2294_v25, %v6017_v22  ;;  %v4824_v25 = vld [vmem:[#allocation14 + $0x24] ss:$8 sps:$4 sm:$0xff]  }
 0x355   : > { %v2071_v36 = vcombine.low %v2062_v33, %v2070_v34  ;;  %v2072_v38 = vcombine.high %v2062_v33, %v2070_v34 }
 0x356   : > { %v6172_v39 = vsel %vm2346_vm1, %v2074_v35, 0  ;;  %v2348_v30 = vsel %vm2346_vm1, %v2073_v21, 0  ;;  %v4818_v21 = vld [vmem:[#allocation14 + $0x4] ss:$8 sps:$4 sm:$0xff]  }
 0x357   : > { %v2075_v37 = vpack.c.bf16 %v2071_v36, %v2071_v36  ;;  %v2076_v1 = vpack.c.bf16 %v2072_v38, %v2072_v38  ;;  %2962 = vmatprep.subr.bf16.mxu0 %v4818_v21 }
 0x359   : > { %v6175_v40 = vsel %vm2346_vm1, %v2075_v37, 0  ;;  %v6178_v0 = vsel %vm2346_vm1, %v2076_v1, 0 }
 0x38c   : > { %v2108_v41 = vpop.permute.xlu1 %2107  ;;  %v2110_v44 = vpop.permute.xlu0 %2109 }
 0x38d   : > { %v2115_v42 = vmul.f32 %v2108_v41, %v2078_v5  ;;  %v2116_v47 = vmul.f32 %v2110_v44, %v2078_v5 }
 0x38f   : > { %v2119_v45 = vadd.f32 %v2115_v42, %v2103_v43  ;;  %v2120_v54 = vadd.f32 %v2116_v47, %v2104_v51 }
 0x390   : > { %v2084_v46 = vpop.permute.xlu1 %2083 }
 0x391   : > { %v2123_v48 = vpack.c.bf16 %v2119_v45, %v2119_v45  ;;  %v2091_v49 = vmul.f32 %v2084_v46, %v2078_v5  ;;  %v2124_v57 = vpack.c.bf16 %v2120_v54, %v2120_v54 }
 0x393   : > { %4467 = vmatpush3.bf16.xpose.msra.mxu1 %v2123_v48  ;;  %v2095_v52 = vadd.f32 %v2091_v49, %v2079_v50 }
 0x394   : > { %v2086_v53 = vpop.permute.xlu1 %2085  ;;  %4472 = vmatprep.subr.bf16.mxu1 %v5504_v7 }
 0x395   : > { %v2099_v55 = vpack.c.bf16 %v2095_v52, %v2095_v52  ;;  %v2092_v56 = vmul.f32 %v2086_v53, %v2078_v5 }
 0x397   : > { %v2096_v59 = vadd.f32 %v2092_v56, %v2080_v4 }
 0x398   : > { %v2112_v3 = vpop.permute.xlu1 %2111 }
 0x399   : > { %v2117_v58 = vmul.f32 %v2112_v3, %v2078_v5  ;;  %v2100_v62 = vpack.c.bf16 %v2096_v59, %v2096_v59 }
 0x39a   : > { %4469 = vmatmul.mubr.bf16.vlgmr.msra.gmra.mrb[4].mxu1 %v2099_v55 }
 0x39b   : > { %4473 = vmatpush3.bf16.xpose.msra.mxu1 %v2124_v57  ;;  %4474 = vmatprep.mubr.msk.bf16.mxu1 %vm5508_vm0, %v5504_v7  ;;  %v2121_v8 = vadd.f32 %v2117_v58, %v2105_v6 }
 0x39c   : > { %v2088_v12 = vpop.permute.xlu1 %2087  ;;  %4478 = vmatprep.subr.bf16.mxu1 %v5504_v7 }
 0x39d   : > { %v2093_v60 = vmul.f32 %v2088_v12, %v2078_v5  ;;  %v2125_v63 = vpack.c.bf16 %v2121_v8, %v2121_v8 }
 0x39f   : > { %v2097_v17 = vadd.f32 %v2093_v60, %v2081_v10 }
 0x3a0   : > { %v2114_v61 = vpop.permute.xlu1 %2113 }
 0x3a1   : > { %v2118_v9 = vmul.f32 %v2114_v61, %v2078_v5  ;;  %v2101_v18 = vpack.c.bf16 %v2097_v17, %v2097_v17 }
 0x3a2   : > { %4475 = vmatmul.mubr.bf16.vlgmr.msra.gmra.mrb[8].mxu1 %v2100_v62 }
 0x3a3   : > { %4479 = vmatpush3.bf16.xpose.msra.mxu1 %v2125_v63  ;;  %4480 = vmatprep.mubr.msk.bf16.mxu1 %vm5508_vm0, %v5504_v7  ;;  %v2122_v11 = vadd.f32 %v2118_v9, %v2106_v13 }
 0x3a4   : > { %4484 = vmatprep.subr.bf16.mxu1 %v5504_v7  ;;  %v2090_v16 = vpop.permute.xlu1 %2089 }
 0x3a5   : > { %v2094_v26 = vmul.f32 %v2090_v16, %v2078_v5  ;;  %v2126_v27 = vpack.c.bf16 %v2122_v11, %v2122_v11 }
 0x3a7   : > { %v2098_v19 = vadd.f32 %v2094_v26, %v2082_v28 }
 0x3a9   : > { %v2102_v29 = vpack.c.bf16 %v2098_v19, %v2098_v19  ;;  %v4816_v19 = vld [vmem:[#allocation14] ss:$8 sps:$4 sm:$0xff]  }
 0x3aa   : > { %4481 = vmatmul.mubr.bf16.vlgmr.msra.gmra.mrb[12].mxu1 %v2101_v18  ;;  %2963 = vmatpush1.bf16.msra.mxu0 %v4816_v19 }
 0x3ab   : > { %4485 = vmatpush3.bf16.xpose.msra.mxu1 %v2126_v27  ;;  %4486 = vmatprep.mubr.msk.bf16.mxu1 %vm5508_vm0, %v5504_v7 }
 0x3ac   : > { %4490 = vmatprep.subr.bf16.mxu1 %v5504_v7 }
 0x3b2   : > { %4487 = vmatmul.mubr.bf16.vlgmr.msra.gmra.mrb[16].mxu1 %v2102_v29  ;;  %v4821_v29 = vld [vmem:[#allocation14 + $0x14] ss:$8 sps:$4 sm:$0xff]  }
 0x3b3   : > { %4491 = vmatpush3.bf16.msra.mxu1 %v2348_v30  ;;  %4492 = vmatprep.mubr.msk.bf16.mxu1 %vm5508_vm0, %v5504_v7  ;;  %v4819_v30 = vld [vmem:[#allocation14 + $0x10] ss:$8 sps:$4 sm:$0xff]  }
 0x3b4   : > { %4496 = vmatprep.subr.bf16.mxu1 %v5504_v7  ;;  %2964 = vmatprep.subr.bf16.mxu0 %v4821_v29 }
 0x3b5   : > { %2965 = vmatpush1.bf16.msra.mxu0 %v4819_v30 }
 0x3b6   : > { %2966 = vmatprep.subr.bf16.mxu0 %v4824_v25 }
 0x46d   : > { %v2161_v32 = vpop.f32.mrb[4].mxu1 }
 0x46e   : > { %v2287_v33 = vmul.f32 0.088388346, %v2161_v32  ;;  %v4470_v34 = vpop.f32.mrb[5].mxu1  ;;  %v4827_v32 = vld [vmem:[#allocation14 + $0x34] ss:$8 sps:$4 sm:$0xff]  }
 0x46f   : > { %v2164_v35 = vpop.f32.mrb[6].mxu1  ;;  %v4830_v34 = vld [vmem:[#allocation14 + $0x44] ss:$8 sps:$4 sm:$0xff]  }
 0x470   : > { %v4471_v31 = vpop.f32.mrb[7].mxu1  ;;  %v2298_v36 = vsel %vm2295_vm2, %v2287_v33, -1e+30  ;;  %v4825_v33 = vld [vmem:[#allocation14 + $0x30] ss:$8 sps:$4 sm:$0xff]  }
 0x471   : > { %v2303_v38 = vsel %vm2302_vm3, %v2298_v36, -inf  ;;  %v4828_v35 = vld [vmem:[#allocation14 + $0x40] ss:$8 sps:$4 sm:$0xff]   ;;  %v4833_v31 = vld [vmem:[#allocation14 + $0x54] ss:$8 sps:$4 sm:$0xff]  }
 0x472   : > { %2304 = vmax.xlane.f32.xlu1 %v2303_v38  ;;  %v4836_v38 = vld [vmem:[#allocation14 + $0x64] ss:$8 sps:$4 sm:$0xff]  }
 0x475   : > { %v2201_v37 = vpop.f32.mrb[8].mxu1 }
 0x476   : > { %v2288_v1 = vmul.f32 0.088388346, %v2201_v37  ;;  %v4476_v2 = vpop.f32.mrb[9].mxu1  ;;  %v4834_v37 = vld [vmem:[#allocation14 + $0x60] ss:$8 sps:$4 sm:$0xff]  }
 0x477   : > { %v2204_v5 = vpop.f32.mrb[10].mxu1  ;;  %v4837_v2 = vld [vmem:[#allocation14 + $0x70] ss:$8 sps:$4 sm:$0xff]  }
 0x478   : > { %v4477_v41 = vpop.f32.mrb[11].mxu1  ;;  %v2299_v20 = vsel %vm2295_vm2, %v2288_v1, -1e+30  ;;  %v4839_v1 = vld [vmem:[#allocation14 + $0x74] ss:$8 sps:$4 sm:$0xff]  }
 0x479   : > { %v2306_v43 = vsel %vm2302_vm3, %v2299_v20, -inf  ;;  %v4842_v5 = vld [vmem:[#allocation14 + $0x84] ss:$8 sps:$4 sm:$0xff]   ;;  %v4840_v41 = vld [vmem:[#allocation14 + $0x80] ss:$8 sps:$4 sm:$0xff]  }
 0x47a   : > { %2307 = vmax.xlane.f32.xlu0 %v2306_v43  ;;  %v4843_v43 = vld [vmem:[#allocation14 + $0x90] ss:$8 sps:$4 sm:$0xff]  }
 0x47d   : > { %v2241_v42 = vpop.f32.mrb[12].mxu1 }
 0x47e   : > { %v2289_v44 = vmul.f32 0.088388346, %v2241_v42  ;;  %v4482_v45 = vpop.f32.mrb[13].mxu1  ;;  %v4848_v42 = vld [vmem:[#allocation14 + $0xa4] ss:$8 sps:$4 sm:$0xff]  }
 0x47f   : > { %v2244_v46 = vpop.f32.mrb[14].mxu1  ;;  %v4851_v45 = vld [vmem:[#allocation14 + $0xb4] ss:$8 sps:$4 sm:$0xff]  }
 0x480   : > { %v4483_v47 = vpop.f32.mrb[15].mxu1  ;;  %v2300_v48 = vsel %vm2295_vm2, %v2289_v44, -1e+30  ;;  %v4846_v44 = vld [vmem:[#allocation14 + $0xa0] ss:$8 sps:$4 sm:$0xff]  }
 0x481   : > { %v2309_v49 = vsel %vm2302_vm3, %v2300_v48, -inf  ;;  %v4849_v46 = vld [vmem:[#allocation14 + $0xb0] ss:$8 sps:$4 sm:$0xff]   ;;  %v4852_v47 = vld [vmem:[#allocation14 + $0xc0] ss:$8 sps:$4 sm:$0xff]  }
 0x482   : > { %2310 = vmax.xlane.f32.xlu0 %v2309_v49  ;;  %v4857_v49 = vld [vmem:[#allocation14 + $0xd4] ss:$8 sps:$4 sm:$0xff]  }
 0x485   : > { %v2281_v50 = vpop.f32.mrb[16].mxu1 }
 0x486   : > { %v2290_v51 = vmul.f32 0.088388346, %v2281_v50  ;;  %v4488_v52 = vpop.f32.mrb[17].mxu1  ;;  %v4855_v50 = vld [vmem:[#allocation14 + $0xd0] ss:$8 sps:$4 sm:$0xff]  }
 0x487   : > { %v2284_v53 = vpop.f32.mrb[18].mxu1  ;;  %v4858_v52 = vld [vmem:[#allocation14 + $0xe0] ss:$8 sps:$4 sm:$0xff]  }
 0x488   : > { %v4489_v54 = vpop.f32.mrb[19].mxu1  ;;  %v2301_v55 = vsel %vm2295_vm2, %v2290_v51, -1e+30  ;;  %v4860_v51 = vld [vmem:[#allocation14 + $0xe4] ss:$8 sps:$4 sm:$0xff]  }
 0x489   : > { %v2312_v56 = vsel %vm2302_vm3, %v2301_v55, -inf  ;;  %v4863_v53 = vld [vmem:[#allocation14 + $0xf4] ss:$8 sps:$4 sm:$0xff]   ;;  %v4861_v54 = vld [vmem:[#allocation14 + $0xf0] ss:$8 sps:$4 sm:$0xff]  }
 0x48a   : > { %2313 = vmax.xlane.f32.xlu1 %v2312_v56 }
 0x4ff   : > { %v2305_v3 = vpop.xlane.xlu1 %2304 }
 0x500   : > { %v2315_v57 = vsub.f32 %v2298_v36, %v2305_v3  ;;  %v4831_v36 = vld [vmem:[#allocation14 + $0x50] ss:$8 sps:$4 sm:$0xff]  }
 0x502   : > { %v2319_v58 = vmul.f32 1.442695, %v2315_v57 }
 0x504   : > { %4868 = vpow2.f32 %v2319_v58 }
 0x507   : > { %v2308_v4 = vpop.xlane.xlu0 %2307 }
 0x508   : > { %v2316_v6 = vsub.f32 %v2299_v20, %v2308_v4  ;;  %v4845_v20 = vld [vmem:[#allocation14 + $0x94] ss:$8 sps:$4 sm:$0xff]  }
 0x50a   : > { %v2321_v59 = vmul.f32 1.442695, %v2316_v6 }
 0x50c   : > { %4870 = vpow2.f32 %v2321_v59 }
 0x50e   : > { %v4869_v12 = vpop.eup %4868 }
 0x50f   : > { %v2311_v8 = vpop.xlane.xlu0 %2310  ;;  %v2327_v62 = vsel %vm2302_vm3, %v4869_v12, 0.0  ;;  %v2339_v60 = vpack.c.bf16 %v4869_v12, %v4869_v12 }
 0x510   : > { %v2317_v61 = vsub.f32 %v2300_v48, %v2311_v8  ;;  %2328 = vadd.xlane.f32.xlu0 %v2327_v62  ;;  %v4854_v48 = vld [vmem:[#allocation14 + $0xc4] ss:$8 sps:$4 sm:$0xff]  }
 0x511   : > { %4493 = vmatmul.mubr.msk.bf16.vlgmr.msra.gmra.mrb[20].mxu1 %vm2302_vm3, %v2339_v60 }
 0x512   : > { %v2323_v63 = vmul.f32 1.442695, %v2317_v61  ;;  %4497 = vmatpush3.bf16.msra.mxu1 %v6172_v39  ;;  %4498 = vmatprep.mubr.msk.bf16.mxu1 %vm5508_vm0, %v5504_v7 }
 0x513   : > { %4502 = vmatprep.subr.bf16.mxu1 %v5504_v7 }
 0x514   : > { %4872 = vpow2.f32 %v2323_v63 }
 0x516   : > { %v4871_v9 = vpop.eup %4870 }
 0x517   : > { %v2314_v10 = vpop.xlane.xlu1 %2313  ;;  %v2330_v13 = vsel %vm2302_vm3, %v4871_v9, 0.0  ;;  %v2340_v17 = vpack.c.bf16 %v4871_v9, %v4871_v9 }
 0x518   : > { %v2318_v11 = vsub.f32 %v2301_v55, %v2314_v10  ;;  %2331 = vadd.xlane.f32.xlu1 %v2330_v13 }
 0x519   : > { %4499 = vmatmul.mubr.msk.bf16.vlgmr.msra.gmra.mrb[24].mxu1 %vm2302_vm3, %v2340_v17 }
 0x51a   : > { %v2325_v16 = vmul.f32 1.442695, %v2318_v11  ;;  %4503 = vmatpush3.bf16.msra.mxu1 %v6175_v40  ;;  %4504 = vmatprep.mubr.msk.bf16.mxu1 %vm5508_vm0, %v5504_v7 }
 0x51b   : > { %4508 = vmatprep.subr.bf16.mxu1 %v5504_v7 }
 0x51c   : > { %4874 = vpow2.f32 %v2325_v16 }
 0x51e   : > { %v4873_v39 = vpop.eup %4872 }
 0x51f   : > { %v2333_v18 = vsel %vm2302_vm3, %v4873_v39, 0.0  ;;  %v2341_v26 = vpack.c.bf16 %v4873_v39, %v4873_v39 }
 0x520   : > { %2334 = vadd.xlane.f32.xlu0 %v2333_v18 }
 0x521   : > { %4505 = vmatmul.mubr.msk.bf16.vlgmr.msra.gmra.mrb[28].mxu1 %vm2302_vm3, %v2341_v26 }
 0x522   : > { %4509 = vmatpush3.bf16.msra.mxu1 %v6178_v0  ;;  %4510 = vmatprep.mubr.msk.bf16.mxu1 %vm5508_vm0, %v5504_v7  ;;  %v4822_v0 = vld [vmem:[#allocation14 + $0x20] ss:$8 sps:$4 sm:$0xff]  }
 0x523   : > { %2967 = vmatpush1.bf16.msra.mxu0 %v4822_v0 }
 0x524   : > { %2968 = vmatprep.subr.bf16.mxu0 %v4827_v32 }
 0x526   : > { %v4875_v27 = vpop.eup %4874 }
 0x527   : > { %v2336_v40 = vsel %vm2302_vm3, %v4875_v27, 0.0  ;;  %v2342_v28 = vpack.c.bf16 %v4875_v27, %v4875_v27  ;;  %2969 = vmatpush1.bf16.msra.mxu0 %v4825_v33 }
 0x528   : > { %2337 = vadd.xlane.f32.xlu1 %v2336_v40  ;;  %2970 = vmatprep.subr.bf16.mxu0 %v4830_v34 }
 0x529   : > { %4511 = vmatmul.mubr.msk.bf16.vlgmr.msra.gmra.mrb[32].mxu1 %vm2302_vm3, %v2342_v28 }
 0x52b   : > { %2971 = vmatpush1.bf16.msra.mxu0 %v4828_v35 }
 0x52c   : > { %2972 = vmatprep.subr.bf16.mxu0 %v4833_v31 }
 0x52f   : > { %2973 = vmatpush1.bf16.msra.mxu0 %v4831_v36 }
 0x530   : > { %2974 = vmatprep.subr.bf16.mxu0 %v4836_v38 }
 0x533   : > { %2975 = vmatpush1.bf16.msra.mxu0 %v4834_v37 }
 0x534   : > { %2976 = vmatprep.subr.bf16.mxu0 %v4839_v1 }
 0x537   : > { %2977 = vmatpush1.bf16.msra.mxu0 %v4837_v2 }
 0x538   : > { %2978 = vmatprep.subr.bf16.mxu0 %v4842_v5 }
 0x53b   : > { %2979 = vmatpush1.bf16.msra.mxu0 %v4840_v41 }
 0x53c   : > { %2980 = vmatprep.subr.bf16.mxu0 %v4845_v20 }
 0x53f   : > { %2981 = vmatpush1.bf16.msra.mxu0 %v4843_v43 }
 0x540   : > { %2982 = vmatprep.subr.bf16.mxu0 %v4848_v42 }
 0x543   : > { %2983 = vmatpush1.bf16.msra.mxu0 %v4846_v44 }
 0x544   : > { %2984 = vmatprep.subr.bf16.mxu0 %v4851_v45 }
 0x547   : > { %2985 = vmatpush1.bf16.msra.mxu0 %v4849_v46 }
 0x548   : > { %2986 = vmatprep.subr.bf16.mxu0 %v4854_v48 }
 0x54b   : > { %2987 = vmatpush1.bf16.msra.mxu0 %v4852_v47 }
 0x54c   : > { %2988 = vmatprep.subr.bf16.mxu0 %v4857_v49 }
 0x54f   : > { %2989 = vmatpush1.bf16.msra.mxu0 %v4855_v50 }
 0x550   : > { %2990 = vmatprep.subr.bf16.mxu0 %v4860_v51 }
 0x553   : > { %2991 = vmatpush1.bf16.msra.mxu0 %v4858_v52 }
 0x554   : > { %2992 = vmatprep.subr.bf16.mxu0 %v4863_v53 }
 0x557   : > { %2993 = vmatpush1.bf16.msra.mxu0 %v4861_v54 }
 0x59d   : > { %v2329_v55 = vpop.xlane.xlu0 %2328 }
 0x59e   : > { %4876 = vrcp.f32 %v2329_v55 }
 0x5a5   : > { %v2332_v56 = vpop.xlane.xlu1 %2331 }
 0x5a6   : > { %4878 = vrcp.f32 %v2332_v56 }
 0x5a8   : > { %v4877_v6 = vpop.eup %4876 }
 0x5ad   : > { %v2335_v12 = vpop.xlane.xlu0 %2334 }
 0x5ae   : > { %4880 = vrcp.f32 %v2335_v12 }
 0x5b0   : > { %v4879_v8 = vpop.eup %4878 }
 0x5b5   : > { %v2338_v10 = vpop.xlane.xlu1 %2337 }
 0x5b6   : > { %4882 = vrcp.f32 %v2338_v10 }
 0x5b8   : > { %v4881_v1 = vpop.eup %4880 }
 0x5c0   : > { %v4883_v42 = vpop.eup %4882 }
 0x5e4   : > { %v2384_v3 = vpop.f32.mrb[20].mxu1 }
 0x5e5   : > { %v4494_v57 = vpop.f32.mrb[21].mxu1  ;;  %v2532_v59 = vmul.f32 %v4877_v6, %v2384_v3 }
 0x5e6   : > { %v2387_v58 = vpop.f32.mrb[22].mxu1 }
 0x5e7   : > { %v4495_v4 = vpop.f32.mrb[23].mxu1  ;;  %v2536_v60 = vcombine.high %v2532_v59, %v5504_v7  ;;  %v2543_v13 = vrot.slane %v2532_v59, %v6036_v14 }
 0x5e9   : > { %v2550_v39 = vrot.slane %v2536_v60, %v6036_v14 }
 0x5ec   : > { %v2430_v62 = vpop.f32.mrb[24].mxu1 }
 0x5ed   : > { %v2533_v61 = vmul.f32 %v4879_v8, %v2430_v62  ;;  %v4500_v63 = vpop.f32.mrb[25].mxu1 }
 0x5ee   : > { %v2433_v9 = vpop.f32.mrb[26].mxu1 }
 0x5ef   : > { %v2551_v17 = vcombine.high %v2533_v61, %v5504_v7  ;;  %v2558_v11 = vrot.slane %v2533_v61, %v6036_v14  ;;  %v4501_v16 = vpop.f32.mrb[27].mxu1 }
 0x5f1   : > { %v2565_v18 = vrot.slane %v2551_v17, %v6036_v14  ;;  %v2566_v26 = vcombine.low %v2543_v13, %v2558_v11  ;;  %v2567_v27 = vcombine.high %v2543_v13, %v2558_v11 }
 0x5f3   : > { %v2574_v40 = vrot.slane %v2566_v26, %v6039_v15  ;;  %v2581_v28 = vrot.slane %v2567_v27, %v6039_v15  ;;  %v2582_v19 = vcombine.low %v2550_v39, %v2565_v18  ;;  %v2583_v21 = vcombine.high %v2550_v39, %v2565_v18 }
 0x5f4   : > { %v2476_v29 = vpop.f32.mrb[28].mxu1 }
 0x5f5   : > { %v2590_v30 = vrot.slane %v2582_v19, %v6039_v15  ;;  %v2597_v25 = vrot.slane %v2583_v21, %v6039_v15  ;;  %v2668_v0 = vcombine.low %v2574_v40, %v2581_v28  ;;  %v4302_v32 = vcombine.high %v2574_v40, %v2581_v28  ;;  %v4506_v33 = vpop.f32.mrb[29].mxu1 }
 0x5f6   : > { %v2479_v34 = vpop.f32.mrb[30].mxu1  ;;  %v2534_v2 = vmul.f32 %v4881_v1, %v2476_v29  ;;  %v5509_v21 = vmov 1935823168  }
 0x5f7   : > { %v2675_v35 = vrot.slane %v2668_v0, %v6036_v14  ;;  %v2683_v31 = vrot.slane %v4302_v32, %v6036_v14  ;;  %v2684_v36 = vcombine.low %v2590_v30, %v2597_v25  ;;  %v4303_v38 = vcombine.high %v2590_v30, %v2597_v25  ;;  %v4507_v37 = vpop.f32.mrb[31].mxu1  ;;  %v4888_v0 = vld [vmem:[#allocation3] sm:$0xff] }
 0x5f8   : > { %v2602_v45 = vcombine.high %v2534_v2, %v5504_v7  ;;  %v2609_v50 = vrot.slane %v2534_v2, %v6036_v14  ;;  %v3062_v29 = vunpack.c.l.s4 %v5509_v21 }
 0x5f9   : > { %v2691_v5 = vrot.slane %v2684_v36, %v6036_v14  ;;  %v2699_v41 = vrot.slane %v4303_v38, %v6036_v14  ;;  %v2700_v20 = vcombine.low %v2675_v35, %v2683_v31  ;;  %v4890_v36 = vld [vmem:[#allocation3 + $0x10] sm:$0xff] }
 0x5fa   : > { %v2616_v3 = vrot.slane %v2602_v45, %v6036_v14  ;;  %v3063_v30 = vunpack.c.0.s8 %v3062_v29 }
 0x5fb   : > { %v2708_v43 = vcombine.low %v2691_v5, %v2699_v41  ;;  %v2707_v48 = vrot.slane %v2700_v20, %v6039_v15  ;;  %v4891_v5 = vld [vmem:[#allocation3 + $0x18] sm:$0xff] }
 0x5fc   : > { %v2522_v44 = vpop.f32.mrb[32].mxu1  ;;  %v3066_v31 = vsub.s32 %v3063_v30, %v6017_v22 }
 0x5fd   : > { %v2535_v46 = vmul.f32 %v4883_v42, %v2522_v44  ;;  %v4512_v47 = vpop.f32.mrb[33].mxu1  ;;  %v2715_v49 = vrot.slane %v2708_v43, %v6039_v15 }
 0x5fe   : > { %v2525_v51 = vpop.f32.mrb[34].mxu1 }
 0x5ff   : > { %v2617_v52 = vcombine.high %v2535_v46, %v5504_v7  ;;  %v2624_v53 = vrot.slane %v2535_v46, %v6036_v14  ;;  %v4513_v54 = vpop.f32.mrb[35].mxu1  ;;  %v2717_v55 = vcombine.high %v2707_v48, %v2715_v49  ;;  %v2716_v56 = vcombine.low %v2707_v48, %v2715_v49 }
 0x601   : > { %v2631_v57 = vrot.slane %v2617_v52, %v6036_v14  ;;  %v2632_v58 = vcombine.low %v2609_v50, %v2624_v53  ;;  %v2633_v4 = vcombine.high %v2609_v50, %v2624_v53 }
 0x603   : > { %v2640_v6 = vrot.slane %v2632_v58, %v6039_v15  ;;  %v2647_v59 = vrot.slane %v2633_v4, %v6039_v15  ;;  %v2648_v12 = vcombine.low %v2616_v3, %v2631_v57  ;;  %v2649_v8 = vcombine.high %v2616_v3, %v2631_v57 }
 0x605   : > { %v2656_v62 = vrot.slane %v2648_v12, %v6039_v15  ;;  %v2663_v7 = vrot.slane %v2649_v8, %v6039_v15  ;;  %v2718_v60 = vcombine.low %v2640_v6, %v2647_v59  ;;  %v4304_v61 = vcombine.high %v2640_v6, %v2647_v59  ;;  %v3029_v59 = vld [vmem:[#allocation8] sm:$0x3] }
 0x606   : > { %v3038_v8 = vrot.slane %v3029_v59, %v662_v23 }
 0x607   : > { %v2725_v63 = vrot.slane %v2718_v60, %v6036_v14  ;;  %v2733_v9 = vrot.slane %v4304_v61, %v6036_v14  ;;  %v2734_v10 = vcombine.low %v2656_v62, %v2663_v7  ;;  %v4305_v13 = vcombine.high %v2656_v62, %v2663_v7 }
 0x608   : > { %v3034_v62 = vrot.slane %v3029_v59, %v658_v24 }
 0x609   : > { %v2741_v17 = vrot.slane %v2734_v10, %v6036_v14  ;;  %v2749_v11 = vrot.slane %v4305_v13, %v6036_v14  ;;  %v2750_v16 = vcombine.low %v2725_v63, %v2733_v9  ;;  %v4889_v14 = vld [vmem:[#allocation3 + $0x8] sm:$0xff] }
 0x60b   : > { %v2758_v39 = vcombine.low %v2741_v17, %v2749_v11  ;;  %v2757_v18 = vrot.slane %v2750_v16, %v6039_v15 }
 0x60d   : > { %v2765_v26 = vrot.slane %v2758_v39, %v6039_v15 }
 0x60f   : > { %v2767_v27 = vcombine.high %v2757_v18, %v2765_v26  ;;  %v2766_v40 = vcombine.low %v2757_v18, %v2765_v26 }
 0x611   : > { %v2769_v28 = vpack.c.bf16 %v2767_v27, %v2717_v55  ;;  %v2768_v19 = vpack.c.bf16 %v2766_v40, %v2716_v56 }
 0x613   : > { %2994 = vmatprep.mubr.bf16.mxu0 %v2769_v28 }
 0x614   : > { %2995 = vmatmul.mubr.bf16.vlgmr.msra.gmra.mrb[8].mxu0 %v2768_v19 }
 0x6e7   : > { %v2996_v25 = vpop.f32.mrb[8].mxu0 }
 0x6e8   : > { %v3005_v32 = vadd.f32 %v4888_v0, %v2996_v25  ;;  %v2998_v33 = vpop.f32.mrb[9].mxu0 }
 0x6e9   : > { %v3006_v34 = vadd.f32 %v4889_v14, %v2998_v33  ;;  %v3000_v35 = vpop.f32.mrb[10].mxu0 }
 0x6ea   : > { %v3007_v15 = vadd.f32 %v4890_v36, %v3000_v35  ;;  %v3002_v38 = vpop.f32.mrb[11].mxu0  ;;  %v3009_v37 = vmul.f32 %v3005_v32, %v3005_v32 }
 0x6eb   : > { %v3053_v1 = vcombine.low %v3005_v32, %v3006_v34  ;;  %v3054_v2 = vcombine.high %v3005_v32, %v3006_v34  ;;  %v3008_v41 = vadd.f32 %v4891_v5, %v3002_v38  ;;  %v3010_v20 = vmul.f32 %v3006_v34, %v3006_v34 }
 0x6ec   : > { %v3011_v43 = vmul.f32 %v3007_v15, %v3007_v15 }
 0x6ed   : > { %v3055_v42 = vcombine.low %v3007_v15, %v3008_v41  ;;  %v3056_v44 = vcombine.high %v3007_v15, %v3008_v41  ;;  %v3013_v45 = vadd.f32 %v3010_v20, %v3009_v37  ;;  %v3012_v46 = vmul.f32 %v3008_v41, %v3008_v41 }
 0x6ee   : > { %v3067_v47 = vrot.slane %v3053_v1, %v3066_v31  ;;  %v3074_v48 = vrot.slane %v3054_v2, %v3066_v31 }
 0x6ef   : > { %v3081_v49 = vrot.slane %v3055_v42, %v3066_v31  ;;  %v3088_v50 = vrot.slane %v3056_v44, %v3066_v31  ;;  %3014 = vadd.xlane.f32.xlu0 %v3013_v45  ;;  %v3016_v51 = vadd.f32 %v3012_v46, %v3011_v43 }
 0x6f1   : > { %v3093_v52 = vcombine.low %v3067_v47, %v3081_v49  ;;  %v3094_v53 = vcombine.high %v3067_v47, %v3081_v49  ;;  %v3109_v54 = vcombine.low %v3074_v48, %v3088_v50  ;;  %v3110_v55 = vcombine.high %v3074_v48, %v3088_v50  ;;  %3017 = vadd.xlane.f32.xlu1 %v3016_v51 }
 0x6f3   : > { %4338 = vst.sshfl [vmem:[#allocation23] sm:$0xff pattern:$0x75316420] %v3093_v52  ;;  %4339 = vst.sshfl [vmem:[#allocation23 + $0x8] sm:$0xff pattern:$0x75316420] %v3094_v53 }
 0x6f4   : > { %4340 = vst.sshfl [vmem:[#allocation23 + $0x10] sm:$0xff pattern:$0x75316420] %v3109_v54  ;;  %4341 = vst.sshfl [vmem:[#allocation23 + $0x18] sm:$0xff pattern:$0x75316420] %v3110_v55 }
 0x77c   : > { %v3015_v56 = vpop.xlane.xlu0 %3014 }
 0x77d   : > { %v3019_v3 = vmul.f32 0.00390625, %v3015_v56 }
 0x77e   : > { %v3018_v57 = vpop.xlane.xlu1 %3017 }
 0x77f   : > { %v3021_v58 = vadd.f32 1e-06, %v3019_v3  ;;  %v3020_v4 = vmul.f32 0.00390625, %v3018_v57 }
 0x781   : > { %4884 = vrsqrt.f32 %v3021_v58  ;;  %v3022_v6 = vadd.f32 1e-06, %v3020_v4 }
 0x783   : > { %4886 = vrsqrt.f32 %v3022_v6 }
 0x78b   : > { %v4885_v12 = vpop.eup %4884 }
 0x78c   : > { %v3025_v7 = vmul.f32 %v4885_v12, %v3005_v32  ;;  %v3026_v60 = vmul.f32 %v4885_v12, %v3006_v34 }
 0x78d   : > { %v4887_v61 = vpop.eup %4886 }
 0x78e   : > { %v3027_v63 = vmul.f32 %v4887_v61, %v3007_v15  ;;  %v3028_v9 = vmul.f32 %v4887_v61, %v3008_v41  ;;  %v3041_v10 = vmul.f32 %v3034_v62, %v3025_v7  ;;  %v3042_v13 = vmul.f32 %v3038_v8, %v3026_v60 }
 0x790   : > { %v3043_v17 = vmul.f32 %v3034_v62, %v3027_v63  ;;  %v3044_v11 = vmul.f32 %v3038_v8, %v3028_v9 }
 0x792   : > { %v3045_v16 = vpack.c.bf16 %v3043_v17, %v3041_v10  ;;  %v3046_v39 = vpack.c.bf16 %v3044_v11, %v3042_v13 }
 0x794   : > { %3047 = vst [vmem:[#allocation2] sm:$0xff] %v3045_v16  ;;  %3048 = vst [vmem:[#allocation2 + $0x8] sm:$0xff] %v3046_v39 }
 0x795 PF: > { %v4892_v22 = vld [vmem:[%s5976_s22 + $0x4] ss:$8 sps:$4 sm:$0xff]   ;;  %v4894_v23 = vld [vmem:[%s5976_s22] ss:$8 sps:$4 sm:$0xff]   ;;  %v4895_v24 = vld [vmem:[%s5976_s22 + $0x14] ss:$8 sps:$4 sm:$0xff]  }
 0x796   : > { %3327 = vmatprep.subr.bf16.mxu0 %v4892_v22  ;;  %v4897_v18 = vld [vmem:[%s5976_s22 + $0x10] ss:$8 sps:$4 sm:$0xff]   ;;  %v4898_v26 = vld [vmem:[%s5976_s22 + $0x24] ss:$8 sps:$4 sm:$0xff]   ;;  %v4900_v27 = vld [vmem:[%s5976_s22 + $0x20] ss:$8 sps:$4 sm:$0xff]  }
 0x797   : > { %3328 = vmatpush1.bf16.msra.mxu0 %v4894_v23  ;;  %v4901_v40 = vld [vmem:[%s5976_s22 + $0x34] ss:$8 sps:$4 sm:$0xff]   ;;  %v4913_v28 = vld [vmem:[%s5982_s17 + $0x4] ss:$8 sps:$4 sm:$0xff]   ;;  %v4915_v19 = vld [vmem:[%s5982_s17] ss:$8 sps:$4 sm:$0xff]  }
 0x798   : > { %3329 = vmatprep.subr.bf16.mxu0 %v4895_v24  ;;  %v4903_v21 = vld [vmem:[%s5976_s22 + $0x30] ss:$8 sps:$4 sm:$0xff]   ;;  %v4904_v29 = vld [vmem:[%s5976_s22 + $0x44] ss:$8 sps:$4 sm:$0xff]   ;;  %3562 = vmatprep.subr.bf16.mxu1 %v4913_v28  ;;  %v4919_v30 = vld [vmem:[%s5982_s17 + $0x14] ss:$8 sps:$4 sm:$0xff]  }
 0x799   : > { %3563 = vmatpush1.bf16.msra.mxu1 %v4915_v19  ;;  %v4921_v25 = vld [vmem:[%s5982_s17 + $0x10] ss:$8 sps:$4 sm:$0xff]   ;;  %v4906_v0 = vld [vmem:[%s5976_s22 + $0x40] ss:$8 sps:$4 sm:$0xff]   ;;  %v4925_v32 = vld [vmem:[%s5982_s17 + $0x24] ss:$8 sps:$4 sm:$0xff]  }
 0x79a   : > { %3564 = vmatprep.subr.bf16.mxu1 %v4919_v30  ;;  %v4907_v33 = vld [vmem:[%s5976_s22 + $0x54] ss:$8 sps:$4 sm:$0xff]   ;;  %v4927_v14 = vld [vmem:[%s5982_s17 + $0x20] ss:$8 sps:$4 sm:$0xff]   ;;  %v4909_v35 = vld [vmem:[%s5976_s22 + $0x50] ss:$8 sps:$4 sm:$0xff]  }
 0x79b   : > { %3330 = vmatpush1.bf16.msra.mxu0 %v4897_v18  ;;  %v4931_v34 = vld [vmem:[%s5982_s17 + $0x34] ss:$8 sps:$4 sm:$0xff]   ;;  %v4910_v31 = vld [vmem:[%s5976_s22 + $0x64] ss:$8 sps:$4 sm:$0xff]   ;;  %v4933_v36 = vld [vmem:[%s5982_s17 + $0x30] ss:$8 sps:$4 sm:$0xff]  }
 0x79c   : > { %3331 = vmatprep.subr.bf16.mxu0 %v4898_v26  ;;  %v4937_v15 = vld [vmem:[%s5982_s17 + $0x44] ss:$8 sps:$4 sm:$0xff]   ;;  %v4912_v38 = vld [vmem:[%s5976_s22 + $0x60] ss:$8 sps:$4 sm:$0xff]   ;;  %v4916_v37 = vld [vmem:[%s5976_s22 + $0x74] ss:$8 sps:$4 sm:$0xff]  }
 0x79d   : > { %3565 = vmatpush1.bf16.msra.mxu1 %v4921_v25  ;;  %v4939_v1 = vld [vmem:[%s5982_s17 + $0x40] ss:$8 sps:$4 sm:$0xff]   ;;  %v4943_v2 = vld [vmem:[%s5982_s17 + $0x54] ss:$8 sps:$4 sm:$0xff]   ;;  %v4918_v5 = vld [vmem:[%s5976_s22 + $0x70] ss:$8 sps:$4 sm:$0xff]  }
 0x79e   : > { %3566 = vmatprep.subr.bf16.mxu1 %v4925_v32  ;;  %v4922_v41 = vld [vmem:[%s5976_s22 + $0x84] ss:$8 sps:$4 sm:$0xff]   ;;  %v4945_v20 = vld [vmem:[%s5982_s17 + $0x50] ss:$8 sps:$4 sm:$0xff]   ;;  %v4924_v42 = vld [vmem:[%s5976_s22 + $0x80] ss:$8 sps:$4 sm:$0xff]  }
 0x79f   : > { %3332 = vmatpush1.bf16.msra.mxu0 %v4900_v27  ;;  %v4949_v43 = vld [vmem:[%s5982_s17 + $0x64] ss:$8 sps:$4 sm:$0xff]   ;;  %v4928_v44 = vld [vmem:[%s5976_s22 + $0x94] ss:$8 sps:$4 sm:$0xff]   ;;  %v4951_v45 = vld [vmem:[%s5982_s17 + $0x60] ss:$8 sps:$4 sm:$0xff]  }
 0x7a0   : > { %3333 = vmatprep.subr.bf16.mxu0 %v4901_v40  ;;  %v4955_v46 = vld [vmem:[%s5982_s17 + $0x74] ss:$8 sps:$4 sm:$0xff]   ;;  %v4930_v48 = vld [vmem:[%s5976_s22 + $0x90] ss:$8 sps:$4 sm:$0xff]   ;;  %v4934_v49 = vld [vmem:[%s5976_s22 + $0xa4] ss:$8 sps:$4 sm:$0xff]  }
 0x7a1   : > { %3567 = vmatpush1.bf16.msra.mxu1 %v4927_v14  ;;  %v3134_v47 = vld [vmem:[#allocation2 + $0x8] sm:$0xff]  ;;  %v4961_v51 = vld [vmem:[%s5982_s17 + $0x84] ss:$8 sps:$4 sm:$0xff]   ;;  %v4936_v52 = vld [vmem:[%s5976_s22 + $0xa0] ss:$8 sps:$4 sm:$0xff]   ;;  %s6500_s5 = sld [smem:[#allocation35_spill]] }
 0x7a2   : > { %3568 = vmatprep.subr.bf16.mxu1 %v4931_v34  ;;  %3359 = vmatprep.mubr.bf16.mxu0 %v3134_v47  ;;  %v4957_v50 = vld [vmem:[%s5982_s17 + $0x70] ss:$8 sps:$4 sm:$0xff]   ;;  %v4940_v53 = vld [vmem:[%s5976_s22 + $0xb4] ss:$8 sps:$4 sm:$0xff]   ;;  %v4963_v54 = vld [vmem:[%s5982_s17 + $0x80] ss:$8 sps:$4 sm:$0xff]  }
 0x7a3   : > { %3334 = vmatpush1.bf16.msra.mxu0 %v4903_v21  ;;  %3594 = vmatprep.mubr.bf16.mxu1 %v3134_v47  ;;  %v4967_v55 = vld [vmem:[%s5982_s17 + $0x94] ss:$8 sps:$4 sm:$0xff]   ;;  %v4942_v56 = vld [vmem:[%s5976_s22 + $0xb0] ss:$8 sps:$4 sm:$0xff]   ;;  %v4946_v3 = vld [vmem:[%s5976_s22 + $0xc4] ss:$8 sps:$4 sm:$0xff]  }
 0x7a4   : > { %3335 = vmatprep.subr.bf16.mxu0 %v4904_v29  ;;  %v4969_v57 = vld [vmem:[%s5982_s17 + $0x90] ss:$8 sps:$4 sm:$0xff]   ;;  %v4970_v58 = vld [vmem:[%s5982_s17 + $0xa4] ss:$8 sps:$4 sm:$0xff]   ;;  %v4948_v4 = vld [vmem:[%s5976_s22 + $0xc0] ss:$8 sps:$4 sm:$0xff]  }
 0x7a5   : > { %3569 = vmatpush1.bf16.msra.mxu1 %v4933_v36  ;;  %v4952_v6 = vld [vmem:[%s5976_s22 + $0xd4] ss:$8 sps:$4 sm:$0xff]   ;;  %v4954_v59 = vld [vmem:[%s5976_s22 + $0xd0] ss:$8 sps:$4 sm:$0xff]   ;;  %v4972_v12 = vld [vmem:[%s5982_s17 + $0xa0] ss:$8 sps:$4 sm:$0xff]  }
 0x7a6   : > { %3570 = vmatprep.subr.bf16.mxu1 %v4937_v15  ;;  %v4973_v8 = vld [vmem:[%s5982_s17 + $0xb4] ss:$8 sps:$4 sm:$0xff]   ;;  %v4958_v62 = vld [vmem:[%s5976_s22 + $0xe4] ss:$8 sps:$4 sm:$0xff]   ;;  %v4975_v7 = vld [vmem:[%s5982_s17 + $0xb0] ss:$8 sps:$4 sm:$0xff]  }
 0x7a7   : > { %3336 = vmatpush1.bf16.msra.mxu0 %v4906_v0  ;;  %v4976_v60 = vld [vmem:[%s5982_s17 + $0xc4] ss:$8 sps:$4 sm:$0xff]   ;;  %v4960_v61 = vld [vmem:[%s5976_s22 + $0xe0] ss:$8 sps:$4 sm:$0xff]   ;;  %v4964_v63 = vld [vmem:[%s5976_s22 + $0xf4] ss:$8 sps:$4 sm:$0xff]  }
 0x7a8   : > { %3337 = vmatprep.subr.bf16.mxu0 %v4907_v33  ;;  %v4978_v9 = vld [vmem:[%s5982_s17 + $0xc0] ss:$8 sps:$4 sm:$0xff]   ;;  %v4979_v10 = vld [vmem:[%s5982_s17 + $0xd4] ss:$8 sps:$4 sm:$0xff]   ;;  %v4966_v13 = vld [vmem:[%s5976_s22 + $0xf0] ss:$8 sps:$4 sm:$0xff]  }
 0x7a9   : > { %3571 = vmatpush1.bf16.msra.mxu1 %v4939_v1  ;;  %v4990_v17 = vld [vmem:[%s5984_s13 + $0x4] ss:$8 sps:$4 sm:$0xff]   ;;  %v4981_v11 = vld [vmem:[%s5982_s17 + $0xd0] ss:$8 sps:$4 sm:$0xff]   ;;  %v4988_v22 = vld [vmem:[%s5984_s13] ss:$8 sps:$4 sm:$0xff]  }
 0x7aa   : > { %3572 = vmatprep.subr.bf16.mxu1 %v4943_v2  ;;  %v4982_v16 = vld [vmem:[%s5982_s17 + $0xe4] ss:$8 sps:$4 sm:$0xff]   ;;  %v4993_v23 = vld [vmem:[%s5984_s13 + $0x14] ss:$8 sps:$4 sm:$0xff]   ;;  %v4984_v24 = vld [vmem:[%s5982_s17 + $0xe0] ss:$8 sps:$4 sm:$0xff]  }
 0x7ab   : > { %3338 = vmatpush1.bf16.msra.mxu0 %v4909_v35  ;;  %v3133_v39 = vld [vmem:[#allocation2] sm:$0xff]  ;;  %v4985_v18 = vld [vmem:[%s5982_s17 + $0xf4] ss:$8 sps:$4 sm:$0xff]   ;;  %v4994_v28 = vld [vmem:[%s5984_s13 + $0x20] ss:$8 sps:$4 sm:$0xff]   ;;  %s5511_s27 = smov [#allocation23]  }
 0x7ac   : > { %3339 = vmatprep.subr.bf16.mxu0 %v4910_v31  ;;  %v4991_v26 = vld [vmem:[%s5984_s13 + $0x10] ss:$8 sps:$4 sm:$0xff]   ;;  %v4996_v27 = vld [vmem:[%s5984_s13 + $0x24] ss:$8 sps:$4 sm:$0xff]   ;;  %v4999_v19 = vld [vmem:[%s5984_s13 + $0x34] ss:$8 sps:$4 sm:$0xff]  }
 0x7ad   : > { %3573 = vmatpush1.bf16.msra.mxu1 %v4945_v20  ;;  %v4987_v40 = vld [vmem:[%s5982_s17 + $0xf0] ss:$8 sps:$4 sm:$0xff]   ;;  %v5002_v29 = vld [vmem:[%s5984_s13 + $0x44] ss:$8 sps:$4 sm:$0xff]   ;;  %v5000_v30 = vld [vmem:[%s5984_s13 + $0x40] ss:$8 sps:$4 sm:$0xff]  }
 0x7ae   : > { %3574 = vmatprep.subr.bf16.mxu1 %v4949_v43  ;;  %v4997_v21 = vld [vmem:[%s5984_s13 + $0x30] ss:$8 sps:$4 sm:$0xff]   ;;  %v5005_v25 = vld [vmem:[%s5984_s13 + $0x54] ss:$8 sps:$4 sm:$0xff]   ;;  %v5008_v32 = vld [vmem:[%s5984_s13 + $0x64] ss:$8 sps:$4 sm:$0xff]  }
 0x7af   : > { %3340 = vmatpush1.bf16.msra.mxu0 %v4912_v38  ;;  %v5003_v0 = vld [vmem:[%s5984_s13 + $0x50] ss:$8 sps:$4 sm:$0xff]   ;;  %v5006_v33 = vld [vmem:[%s5984_s13 + $0x60] ss:$8 sps:$4 sm:$0xff]   ;;  %v5011_v14 = vld [vmem:[%s5984_s13 + $0x74] ss:$8 sps:$4 sm:$0xff]  }
 0x7b0   : > { %3341 = vmatprep.subr.bf16.mxu0 %v4916_v37  ;;  %v5009_v34 = vld [vmem:[%s5984_s13 + $0x70] ss:$8 sps:$4 sm:$0xff]   ;;  %v5014_v35 = vld [vmem:[%s5984_s13 + $0x84] ss:$8 sps:$4 sm:$0xff]   ;;  %v5012_v31 = vld [vmem:[%s5984_s13 + $0x80] ss:$8 sps:$4 sm:$0xff]  }
 0x7b1   : > { %3575 = vmatpush1.bf16.msra.mxu1 %v4951_v45  ;;  %v5017_v36 = vld [vmem:[%s5984_s13 + $0x94] ss:$8 sps:$4 sm:$0xff]   ;;  %v5015_v15 = vld [vmem:[%s5984_s13 + $0x90] ss:$8 sps:$4 sm:$0xff]   ;;  %v5020_v38 = vld [vmem:[%s5984_s13 + $0xa4] ss:$8 sps:$4 sm:$0xff]  }
 0x7b2   : > { %3576 = vmatprep.subr.bf16.mxu1 %v4955_v46  ;;  %v5018_v37 = vld [vmem:[%s5984_s13 + $0xa0] ss:$8 sps:$4 sm:$0xff]   ;;  %v5023_v1 = vld [vmem:[%s5984_s13 + $0xb4] ss:$8 sps:$4 sm:$0xff]   ;;  %v5021_v2 = vld [vmem:[%s5984_s13 + $0xb0] ss:$8 sps:$4 sm:$0xff]  }
 0x7b3   : > { %3342 = vmatpush1.bf16.msra.mxu0 %v4918_v5  ;;  %v5026_v5 = vld [vmem:[%s5984_s13 + $0xc4] ss:$8 sps:$4 sm:$0xff]   ;;  %v5029_v20 = vld [vmem:[%s5984_s13 + $0xd4] ss:$8 sps:$4 sm:$0xff]   ;;  %v5027_v43 = vld [vmem:[%s5984_s13 + $0xd0] ss:$8 sps:$4 sm:$0xff]  }
 0x7b4   : > { %3343 = vmatprep.subr.bf16.mxu0 %v4922_v41  ;;  %v5024_v41 = vld [vmem:[%s5984_s13 + $0xc0] ss:$8 sps:$4 sm:$0xff]   ;;  %v5035_v45 = vld [vmem:[%s5984_s13 + $0xf4] ss:$8 sps:$4 sm:$0xff]   ;;  %v5033_v46 = vld [vmem:[%s5984_s13 + $0xf0] ss:$8 sps:$4 sm:$0xff]  }
 0x7b5   : > { %3577 = vmatpush1.bf16.msra.mxu1 %v4957_v50  ;;  %s3973_s28 = sshll.u32 %s5511_s27, 4  ;;  %p4617_p6 = scmp.eq.s32.totalorder %s6500_s5, 1  ;;  %s3974_s28 = int_to_ptr.vmem [resolvable:$true] %s3973_s28 }
 0x7b6   : > { %3578 = vmatprep.subr.bf16.mxu1 %v4961_v51  ;;  %s5394_s26 = scalar_lea.vmem %s3974_s28, 512  ;;  %p5401_p3 = scmp.lt.s32.totalorder %s3974_s28, %s3974_s28 }
 0x7b7   : > { %3344 = vmatpush1.bf16.msra.mxu0 %v4924_v42  ;;  %v5032_v42 = vld [vmem:[%s5984_s13 + $0xe4] ss:$8 sps:$4 sm:$0xff]   ;;  %p5395_p0 = scmp.ne.s32.totalorder %s3974_s28, %s5394_s26  ;;  %p5402_p7 = scmp.lt.s32.totalorder %s5394_s26, %s5394_s26 }
 0x7b8   : > { %3345 = vmatprep.subr.bf16.mxu0 %v4928_v44  ;;  %v5030_v44 = vld [vmem:[%s5984_s13 + $0xe0] ss:$8 sps:$4 sm:$0xff]  }
 0x7b9   : > { %3579 = vmatpush1.bf16.msra.mxu1 %v4963_v54  ;;  %p5396_p5 = pnand %p5395_p0, %p4617_p6  ;;  %p5403_p8 = por %p5402_p7, %p5401_p3 }
 0x7ba   : > { %3580 = vmatprep.subr.bf16.mxu1 %v4967_v55 }
 0x7bb   : > { %3346 = vmatpush1.bf16.msra.mxu0 %v4930_v48  ;;  %p5397_p9 = pneg %p5396_p5 }
 0x7bc   : > { %3347 = vmatprep.subr.bf16.mxu0 %v4934_v49 }
 0x7bd   : > { %3581 = vmatpush1.bf16.msra.mxu1 %v4969_v57  ;;  %p5404_p11 = pnand %p5403_p8, %p5397_p9 }
 0x7be   : > { %3582 = vmatprep.subr.bf16.mxu1 %v4970_v58 }
 0x7bf   : > { %3348 = vmatpush1.bf16.msra.mxu0 %v4936_v52 }
 0x7c0   : > { %3349 = vmatprep.subr.bf16.mxu0 %v4940_v53 }
 0x7c1   : > { %3583 = vmatpush1.bf16.msra.mxu1 %v4972_v12 }
 0x7c2   : > { %3584 = vmatprep.subr.bf16.mxu1 %v4973_v8 }
 0x7c3   : > { %3350 = vmatpush1.bf16.msra.mxu0 %v4942_v56 }
 0x7c4   : > { %3351 = vmatprep.subr.bf16.mxu0 %v4946_v3 }
 0x7c5   : > { %3585 = vmatpush1.bf16.msra.mxu1 %v4975_v7 }
 0x7c6   : > { %3586 = vmatprep.subr.bf16.mxu1 %v4976_v60 }
 0x7c7   : > { %3352 = vmatpush1.bf16.msra.mxu0 %v4948_v4 }
 0x7c8   : > { %3353 = vmatprep.subr.bf16.mxu0 %v4952_v6 }
 0x7c9   : > { %3587 = vmatpush1.bf16.msra.mxu1 %v4978_v9 }
 0x7ca   : > { %3588 = vmatprep.subr.bf16.mxu1 %v4979_v10 }
 0x7cb   : > { %3354 = vmatpush1.bf16.msra.mxu0 %v4954_v59 }
 0x7cc   : > { %3355 = vmatprep.subr.bf16.mxu0 %v4958_v62 }
 0x7cd   : > { %3589 = vmatpush1.bf16.msra.mxu1 %v4981_v11 }
 0x7ce   : > { %3590 = vmatprep.subr.bf16.mxu1 %v4982_v16 }
 0x7cf   : > { %3356 = vmatpush1.bf16.msra.mxu0 %v4960_v61 }
 0x7d0   : > { %3357 = vmatprep.subr.bf16.mxu0 %v4964_v63 }
 0x7d1   : > { %3591 = vmatpush1.bf16.msra.mxu1 %v4984_v24 }
 0x7d2   : > { %3592 = vmatprep.subr.bf16.mxu1 %v4985_v18 }
 0x7d3   : > { %3358 = vmatpush1.bf16.msra.mxu0 %v4966_v13 }
 0x7d4   : > { %3831 = vmatprep.subr.bf16.mxu0 %v4990_v17 }
 0x7d5   : > { %3593 = vmatpush1.bf16.msra.mxu1 %v4987_v40  ;;  %v3893_v40 = vlaneseq }
 0x7d6   : > { %3360 = vmatmul.mubr.bf16.vlgmr.msra.gmra.mrb[0].mxu0 %v3133_v39 }
 0x7d7   : > { %3832 = vmatpush1.bf16.msra.mxu0 %v4988_v22 }
 0x7d8   : > { %3833 = vmatprep.subr.bf16.mxu0 %v4993_v23  ;;  %3595 = vmatmul.mubr.bf16.vlgmr.msra.gmra.mrb[0].mxu1 %v3133_v39 }
 0x7db   : > { %3834 = vmatpush1.bf16.msra.mxu0 %v4991_v26  ;;  %v5510_v26 = vmov 1935823168  }
 0x7dc   : > { %3835 = vmatprep.subr.bf16.mxu0 %v4996_v27  ;;  %v3891_v27 = vunpack.c.l.s4 %v5510_v26 }
 0x7df   : > { %3836 = vmatpush1.bf16.msra.mxu0 %v4994_v28  ;;  %v3892_v28 = vunpack.c.0.s8 %v3891_v27 }
 0x7e0   : > { %3837 = vmatprep.subr.bf16.mxu0 %v4999_v19  ;;  %v3894_v19 = vshrl.u32 %v3893_v40, 7 }
 0x7e3   : > { %3838 = vmatpush1.bf16.msra.mxu0 %v4997_v21 }
 0x7e4   : > { %3839 = vmatprep.subr.bf16.mxu0 %v5002_v29 }
 0x7e7   : > { %3840 = vmatpush1.bf16.msra.mxu0 %v5000_v30 }
 0x7e8   : > { %3841 = vmatprep.subr.bf16.mxu0 %v5005_v25 }
 0x7eb   : > { %3842 = vmatpush1.bf16.msra.mxu0 %v5003_v0  ;;  %v3895_v0 = vsub.s32 %v3892_v28, %v3894_v19 }
 0x7ec   : > { %3843 = vmatprep.subr.bf16.mxu0 %v5008_v32 }
 0x7ef   : > { %3844 = vmatpush1.bf16.msra.mxu0 %v5006_v33 }
 0x7f0   : > { %3845 = vmatprep.subr.bf16.mxu0 %v5011_v14 }
 0x7f3   : > { %3846 = vmatpush1.bf16.msra.mxu0 %v5009_v34 }
 0x7f4   : > { %3847 = vmatprep.subr.bf16.mxu0 %v5014_v35 }
 0x7f7   : > { %3848 = vmatpush1.bf16.msra.mxu0 %v5012_v31 }
 0x7f8   : > { %3849 = vmatprep.subr.bf16.mxu0 %v5017_v36 }
 0x7fb   : > { %3850 = vmatpush1.bf16.msra.mxu0 %v5015_v15 }
 0x7fc   : > { %3851 = vmatprep.subr.bf16.mxu0 %v5020_v38  ;;  %v3874_v38 = vld [vmem:[#allocation23] sm:$0xff] }
 0x7ff   : > { %3852 = vmatpush1.bf16.msra.mxu0 %v5018_v37 }
 0x800   : > { %3853 = vmatprep.subr.bf16.mxu0 %v5023_v1 }
 0x803   : > { %3854 = vmatpush1.bf16.msra.mxu0 %v5021_v2 }
 0x804   : > { %3855 = vmatprep.subr.bf16.mxu0 %v5026_v5 }
 0x807   : > { %3856 = vmatpush1.bf16.msra.mxu0 %v5024_v41  ;;  %v3875_v41 = vld [vmem:[#allocation23 + $0x8] sm:$0xff] }
 0x808   : > { %3857 = vmatprep.subr.bf16.mxu0 %v5029_v20  ;;  %v3876_v20 = vld [vmem:[#allocation23 + $0x10] sm:$0xff] }
 0x80b   : > { %3858 = vmatpush1.bf16.msra.mxu0 %v5027_v43  ;;  %v3877_v43 = vld [vmem:[#allocation23 + $0x18] sm:$0xff] }
 0x80c   : > { %3859 = vmatprep.subr.bf16.mxu0 %v5032_v42 }
 0x80f   : > { %3860 = vmatpush1.bf16.msra.mxu0 %v5030_v44 }
 0x810   : > { %3861 = vmatprep.subr.bf16.mxu0 %v5035_v45 }
 0x813   : > { %3862 = vmatpush1.bf16.msra.mxu0 %v5033_v46 }
 0x8a9   : > { %v3361_v47 = vpop.f32.mrb[0].mxu0 }
 0x8aa   : > { %v4406_v48 = vmul.f32 -1.442695, %v3361_v47  ;;  %v3363_v49 = vpop.f32.mrb[1].mxu0 }
 0x8ab   : > { %v4407_v50 = vmul.f32 -1.442695, %v3363_v49  ;;  %v3365_v51 = vpop.f32.mrb[2].mxu0  ;;  %v3596_v55 = vpop.f32.mrb[0].mxu1 }
 0x8ac   : > { %5036 = vpow2.f32 %v4406_v48  ;;  %v4408_v52 = vmul.f32 -1.442695, %v3365_v51  ;;  %v3367_v53 = vpop.f32.mrb[3].mxu0  ;;  %v3598_v56 = vpop.f32.mrb[1].mxu1 }
 0x8ad   : > { %5038 = vpow2.f32 %v4407_v50  ;;  %v4409_v54 = vmul.f32 -1.442695, %v3367_v53  ;;  %v3600_v3 = vpop.f32.mrb[2].mxu1 }
 0x8ae   : > { %5040 = vpow2.f32 %v4408_v52  ;;  %v3602_v58 = vpop.f32.mrb[3].mxu1 }
 0x8af   : > { %5042 = vpow2.f32 %v4409_v54 }
 0x8b6   : > { %v5037_v57 = vpop.eup %5036 }
 0x8b7   : > { %v5039_v4 = vpop.eup %5038  ;;  %v3617_v6 = vadd.f32 1.0, %v5037_v57 }
 0x8b8   : > { %v5041_v59 = vpop.eup %5040  ;;  %v3618_v12 = vadd.f32 1.0, %v5039_v4 }
 0x8b9   : > { %v5043_v8 = vpop.eup %5042  ;;  %5044 = vrcp.f32 %v3617_v6  ;;  %v3619_v62 = vadd.f32 1.0, %v5041_v59 }
 0x8ba   : > { %5046 = vrcp.f32 %v3618_v12  ;;  %v3620_v7 = vadd.f32 1.0, %v5043_v8 }
 0x8bb   : > { %5048 = vrcp.f32 %v3619_v62 }
 0x8bc   : > { %5050 = vrcp.f32 %v3620_v7 }
 0x8c3   : > { %v5045_v60 = vpop.eup %5044 }
 0x8c4   : > { %v5047_v61 = vpop.eup %5046  ;;  %v3629_v63 = vmul.f32 %v5045_v60, %v3361_v47 }
 0x8c5   : > { %v5049_v9 = vpop.eup %5048  ;;  %v3630_v10 = vmul.f32 %v5047_v61, %v3363_v49 }
 0x8c6   : > { %v5051_v13 = vpop.eup %5050  ;;  %v3631_v17 = vmul.f32 %v5049_v9, %v3365_v51  ;;  %v3633_v11 = vmul.f32 %v3629_v63, %v3596_v55 }
 0x8c7   : > { %v3632_v16 = vmul.f32 %v5051_v13, %v3367_v53  ;;  %v3634_v39 = vmul.f32 %v3630_v10, %v3598_v56 }
 0x8c8   : > { %v3635_v22 = vmul.f32 %v3631_v17, %v3600_v3 }
 0x8c9   : > { %v3636_v23 = vmul.f32 %v3632_v16, %v3602_v58 }
 0x8ca   : > { %v3637_v24 = vpack.c.bf16 %v3635_v22, %v3633_v11 }
 0x8cb   : > { %v3638_v18 = vpack.c.bf16 %v3636_v23, %v3634_v39 }
 0x8cd   : > { %3863 = vmatprep.mubr.bf16.mxu0 %v3638_v18 }
 0x8ce   : > { %3864 = vmatmul.mubr.bf16.vlgmr.msra.gmra.mrb[4].mxu0 %v3637_v24 }
 0x9a1   : > { %v3865_v21 = vpop.f32.mrb[4].mxu0 }
 0x9a2   : > { %v3867_v29 = vpop.f32.mrb[5].mxu0 }
 0x9a3   : > { %v3882_v30 = vcombine.low %v3865_v21, %v3867_v29  ;;  %v3883_v25 = vcombine.high %v3865_v21, %v3867_v29  ;;  %v3869_v32 = vpop.f32.mrb[6].mxu0 }
 0x9a4   : > { %v3871_v33 = vpop.f32.mrb[7].mxu0 }
 0x9a5   : > { %v3884_v14 = vcombine.low %v3869_v32, %v3871_v33  ;;  %v3885_v34 = vcombine.high %v3869_v32, %v3871_v33  ;;  %v3896_v35 = vrot.slane %v3882_v30, %v3895_v0  ;;  %v3903_v31 = vrot.slane %v3883_v25, %v3895_v0 }
 0x9a7   : > { %v3910_v36 = vrot.slane %v3884_v14, %v3895_v0  ;;  %v3917_v15 = vrot.slane %v3885_v34, %v3895_v0 }
 0x9a9   : > { %v3922_v37 = vcombine.low %v3896_v35, %v3910_v36  ;;  %v3923_v1 = vcombine.high %v3896_v35, %v3910_v36  ;;  %v3938_v2 = vcombine.low %v3903_v31, %v3917_v15  ;;  %v3939_v5 = vcombine.high %v3903_v31, %v3917_v15 }
 0x9ab   : > { %v3930_v42 = vrot.slane %v3922_v37, %v3895_v0  ;;  %v3937_v44 = vrot.slane %v3923_v1, %v3895_v0  ;;  %v3946_v45 = vrot.slane %v3938_v2, %v3895_v0  ;;  %v3953_v46 = vrot.slane %v3939_v5, %v3895_v0 }
 0x9ad   : > { %v3958_v47 = vadd.f32 %v3930_v42, %v3874_v38  ;;  %v3959_v48 = vadd.f32 %v3937_v44, %v3875_v41  ;;  %v3960_v49 = vadd.f32 %v3946_v45, %v3876_v20  ;;  %v3961_v50 = vadd.f32 %v3953_v46, %v3877_v43 }
 0x9af   : > { %3962 = vst [vmem:[#allocation23] sm:$0xff] %v3958_v47  ;;  %3963 = vst [vmem:[#allocation23 + $0x8] sm:$0xff] %v3959_v48 }
 0x9b0   : > { %3964 = vst [vmem:[#allocation23 + $0x10] sm:$0xff] %v3960_v49  ;;  %3965 = vst [vmem:[#allocation23 + $0x18] sm:$0xff] %v3961_v50 }
 0x9b1   : > { %5407 = shalt.err (!%p5404_p11)
}
 0x9b2   : > { %s6501_s10 = sld [smem:[#allocation46_spill]] }
 0x9b8   : > { %s5408_s24 = scalar_lea.hbm %s6501_s10, 512 }
 0x9b9   : > { %p5409_p2 = scmp.ne.s32.totalorder %s6501_s10, %s5408_s24  ;;  %p5414_p10 = scmp.lt.u32.totalorder %s5408_s24, %s6501_s10 }
 0x9bb   : > { %p5410_p1 = pnand %p5409_p2, %p4617_p6 }
 0x9bd   : > { %p5411_p4 = pneg %p5410_p1 }
 0x9bf   : > { %p5416_p12 = pnand %p5414_p10, %p5411_p4 }
 0x9c1   : > { %5419 = shalt.err (!%p5416_p12)
}
 0x9c2   : > { %4557 = dma.vmem_to_hbm [thread:$0]  (%p4617_p6), %s3974_s28, 512, %s6501_s10, [#allocation5]  }
 0x9c3   : > { %5469 = dma.done.wait (%p4617_p6), [#allocation5], 512  }
 0x9c4   : > { %5471 = vsyncadd (%p4617_p6), [#allocation5], 4294966784 }
 0x9c5 PF: > { %s6502_s24 = sld [smem:[#allocation37_spill]]  ;;  %s6503_s21 = sld [smem:[#allocation33_spill]] }
 0x9c6   : > { %s6504_s22 = sld [smem:[#allocation34_spill]]  ;;  %s6505_s23 = sld [smem:[#allocation38_spill]] }
 0x9cb   : > { %p31_p13 = scmp.ge.s32.totalorder %s6502_s24, 4  }
 0x9cd   :  { %33 = sbr.rel (!%p31_p13) target bundleno = 19 (0x13), region = 170 }
 0x9d4   :  { %3986 = vsyncpa [#allocation4], 1 }
 0x9d5   :  { %3988 = vsyncpa [#allocation4 + $0x1], 1 }
 0x9d6   :  { %3989 = vsyncpa [#allocation7], 1 }
 0x9d7   :  { %3990 = vsyncpa [#allocation10], 1 }
 0x9d8   :  { %3991 = vsyncpa [#allocation13], 1 }
 0x9d9   :  { %3992 = vsyncpa [#allocation16], 1 }
 0x9da   :  { %3994 = vsyncpa [#allocation16 + $0x1], 1 }
 0x9db   :  { %3995 = vsyncpa [#allocation19], 1 }
 0x9dc   :  { %3997 = vsyncpa [#allocation19 + $0x1], 1 }
 0x9dd   :  { %3998 = vsyncpa [#allocation22], 1 }
 0x9de   :  { %3999 = vsyncpa [#allocation5], 1 }
 0x9df   :  { %4001 = vsyncpa [#allocation5 + $0x1], 1 }

</bundles_post_ra>
